<compile_context>
chip_gen: v6e
topology: v6e:2x2x1
jax: 0.10.0
libtpu: 0.0.40
codegen_flags: <defaults>
</compile_context>

<pallas_src>
import numpy as np
import jax
import jax.numpy as jnp
from jax.experimental import pallas as pl
from jax.experimental.pallas import tpu as pltpu


# ---------------------------------------------------------------------------
# Weight folding: nearest-2x upsample folded into the 3x3 conv.
# ---------------------------------------------------------------------------
def _subpixel_weights(weight_oihw):
    """-> (4, 4, Cin, Cout) f32.

    Axis 0: output parity 2a+b (a = row parity, b = col parity).
    Axis 1: effective 2x2 tap 2*ry+rx acting on the zero-padded ORIGINAL
    resolution input at padded offsets (p + a + ry, q + b + rx).
    """
    wt = jnp.transpose(weight_oihw, (2, 3, 1, 0)).astype(jnp.float32)    # (kh,kw,Ci,Co)
    rows = jnp.stack([jnp.stack([wt[0], wt[1] + wt[2]], axis=0),         # a=0: [w0, w1+w2]
                      jnp.stack([wt[0] + wt[1], wt[2]], axis=0)],        # a=1: [w0+w1, w2]
                     axis=0)                                             # (a, ry, kw, Ci, Co)
    c0 = jnp.stack([rows[:, :, 0], rows[:, :, 1] + rows[:, :, 2]], axis=2)   # b=0
    c1 = jnp.stack([rows[:, :, 0] + rows[:, :, 1], rows[:, :, 2]], axis=2)   # b=1
    weff = jnp.stack([c0, c1], axis=1)                                   # (a,b,ry,rx,Ci,Co)
    cin, cout = weight_oihw.shape[1], weight_oihw.shape[0]
    return weff.reshape(4, 4, cin, cout)


def _packed_weights(weff, cin, cout):
    """(4,4,Cin,Cout) per-parity 2x2 kernels -> (9, Cin, 4*Cout) window-packed."""
    wpk = jnp.zeros((9, 4, cin, cout), jnp.float32)
    for a in range(2):
        for b in range(2):
            for ry in range(2):
                for rx in range(2):
                    dy, dx = a + ry, b + rx
                    wpk = wpk.at[3 * dy + dx, 2 * a + b].set(
                        weff[2 * a + b, 2 * ry + rx])
    return jnp.transpose(wpk, (0, 2, 1, 3)).reshape(9, cin, 4 * cout)


# ---------------------------------------------------------------------------
# Kernels
# ---------------------------------------------------------------------------
def _upsample_packed_kernel(xp_ref, w_ref, b_ref, o_ref):
    """Small-Cout path: parities packed onto lanes.

    xp_ref: (1, Hp+2, W+2, Cin)  zero-padded ORIGINAL-resolution image
    w_ref : (9, Cin, 4*Cout)     window-packed effective weights
    b_ref : (1, 4*Cout)          f32 bias, parity-tiled
    o_ref : (1, TH, W, 4*Cout)   output row tile, parity-major last dim
    """
    TH, W, P = o_ref.shape[1], o_ref.shape[2], o_ref.shape[3]
    Cin = xp_ref.shape[3]
    row0 = pl.multiple_of(pl.program_id(1) * TH, 8)

    acc = jnp.broadcast_to(b_ref[...], (TH * W, P))            # f32
    for dx in range(3):
        # One sublane-unaligned column slice per dx (3 total per grid step).
        colslab = xp_ref[0, pl.ds(row0, TH + 2), pl.ds(dx, W), :]     # (TH+2, W, Cin)
        for dy in range(3):
            patch = colslab[dy:dy + TH].reshape(TH * W, Cin)
            acc = acc + jnp.dot(patch, w_ref[3 * dy + dx],
                                preferred_element_type=jnp.float32)
    o_ref[0] = acc.reshape(TH, W, P).astype(o_ref.dtype)


def _upsample_mxu_kernel(xp_ref, w_ref, b_ref, o_ref):
    """Large-Cout path: per-parity 2x2 matmuls, Cout-blocked.

    xp_ref: (1, Hp+2, W+2, Cin)
    w_ref : (4, 4, Cin, CoutB)   [parity=2a+b, tap=2ry+rx]
    b_ref : (1, CoutB)           f32 bias block
    o_ref : (4, TH, W, CoutB)    parity-major output row tile
    """
    TH, W, CoutB = o_ref.shape[1], o_ref.shape[2], o_ref.shape[3]
    Cin = xp_ref.shape[3]
    row0 = pl.multiple_of(pl.program_id(2) * TH, 8)

    bc = jnp.broadcast_to(b_ref[...], (TH * W, CoutB))          # f32
    accs = [bc, bc, bc, bc]
    for dx in range(3):
        colslab = xp_ref[0, pl.ds(row0, TH + 2), pl.ds(dx, W), :]     # (TH+2, W, Cin)
        for dy in range(3):
            patch = colslab[dy:dy + TH].reshape(TH * W, Cin)
            for a in range(max(0, dy - 1), min(1, dy) + 1):
                ry = dy - a
                for b in range(max(0, dx - 1), min(1, dx) + 1):
                    rx = dx - b
                    p = 2 * a + b
                    accs[p] = accs[p] + jnp.dot(
                        patch, w_ref[p, 2 * ry + rx],
                        preferred_element_type=jnp.float32)
    for p in range(4):
        o_ref[p] = accs[p].reshape(TH, W, CoutB).astype(o_ref.dtype)


# ---------------------------------------------------------------------------
# Wrapper
# ---------------------------------------------------------------------------
def _vmem_limit(block_bytes, acc_bytes):
    need = 2 * block_bytes + acc_bytes          # double-buffered operand blocks + accs
    need = int(need * 1.4) + (2 << 20)          # Mosaic internal scratch headroom
    return max(16 << 20, min(need, 112 << 20))


def upsample_forward(x_nchw, weight_oihw, bias, *, compute_dtype=jnp.bfloat16,
                     out_dtype=None, row_tile=32, cout_block=None):
    """Forward of Upsample(channels, use_conv=True, dims=2, padding=1), NCHW."""
    N, C, H, W = x_nchw.shape
    Cout = weight_oihw.shape[0]
    out_dtype = out_dtype or x_nchw.dtype
    c_item = np.dtype(compute_dtype).itemsize
    o_item = np.dtype(out_dtype).itemsize

    # Row tiling: multiple-of-8 tile height, H padded up to a whole number of
    # tiles and cropped afterwards (never degrades to th=1).
    th = max(8, min(row_tile, H))
    th = -(-th // 8) * 8
    n_rows = -(-H // th)
    Hp = n_rows * th

    # Only the ORIGINAL-resolution tensor is transposed / zero-padded; the 2x
    # upsampled intermediate never exists in HBM.
    x_nhwc = jnp.transpose(x_nchw, (0, 2, 3, 1)).astype(compute_dtype)
    xp = jnp.pad(x_nhwc, ((0, 0), (1, 1 + Hp - H), (1, 1), (0, 0)))   # (N, Hp+2, W+2, C)

    weff = _subpixel_weights(weight_oihw)                              # (4,4,C,Cout) f32
    in_img_bytes = (Hp + 2) * (W + 2) * C * c_item

    if Cout < 128:
        # ---- Small-Cout path: pack the 4 output parities onto lanes. ----
        P = 4 * Cout
        wpk = _packed_weights(weff, C, Cout).astype(compute_dtype)     # (9, C, P)
        bpk = jnp.tile(bias.astype(jnp.float32), 4).reshape(1, P)
        blk = in_img_bytes + 9 * C * P * c_item + P * 4 + th * W * P * o_item
        vlim = _vmem_limit(blk, th * W * P * 4)

        out = pl.pallas_call(
            _upsample_packed_kernel,
            out_shape=jax.ShapeDtypeStruct((N, Hp, W, P), out_dtype),
            grid_spec=pltpu.PrefetchScalarGridSpec(
                num_scalar_prefetch=0,
                grid=(N, n_rows),
                in_specs=[
                    pl.BlockSpec((1, Hp + 2, W + 2, C), lambda n, i: (n, 0, 0, 0)),
                    pl.BlockSpec((9, C, P), lambda n, i: (0, 0, 0)),
                    pl.BlockSpec((1, P), lambda n, i: (0, 0)),
                ],
                out_specs=pl.BlockSpec((1, th, W, P), lambda n, i: (n, i, 0, 0)),
            ),
            compiler_params=pltpu.CompilerParams(
                dimension_semantics=("parallel", "arbitrary"),
                vmem_limit_bytes=vlim),
        )(xp, wpk, bpk)

        out = out[:, :H].reshape(N, H, W, 2, 2, Cout)
        out = jnp.transpose(out, (0, 5, 1, 3, 2, 4)).reshape(N, Cout, 2 * H, 2 * W)
        return out

    # ---- MXU path (Cout >= 128): Cout tiled to an MXU-native block. ----
    cb = cout_block or (256 if Cout % 256 == 0 else 128)
    if Cout % cb:
        cb = Cout
    n_cout = Cout // cb
    wm = weff.astype(compute_dtype)                                    # (4,4,C,Cout)
    bm = bias.astype(jnp.float32).reshape(1, Cout)
    blk = in_img_bytes + 16 * C * cb * c_item + cb * 4 + 4 * th * W * cb * o_item
    vlim = _vmem_limit(blk, 4 * th * W * cb * 4)

    out = pl.pallas_call(
        _upsample_mxu_kernel,
        out_shape=jax.ShapeDtypeStruct((N * 4, Hp, W, Cout), out_dtype),
        grid_spec=pltpu.PrefetchScalarGridSpec(
            num_scalar_prefetch=0,
            grid=(N, n_cout, n_rows),
            in_specs=[
                pl.BlockSpec((1, Hp + 2, W + 2, C), lambda n, j, i: (n, 0, 0, 0)),
                pl.BlockSpec((4, 4, C, cb), lambda n, j, i: (0, 0, 0, j)),
                pl.BlockSpec((1, cb), lambda n, j, i: (0, j)),
            ],
            out_specs=pl.BlockSpec((4, th, W, cb), lambda n, j, i: (n, i, 0, j)),
        ),
        compiler_params=pltpu.CompilerParams(
            dimension_semantics=("parallel", "parallel", "arbitrary"),
            vmem_limit_bytes=vlim),
    )(xp, wm, bm)

    out = out[:, :H].reshape(N, 2, 2, H, W, Cout)
    out = jnp.transpose(out, (0, 5, 3, 1, 4, 2)).reshape(N, Cout, 2 * H, 2 * W)
    return out


# ---------------------------------------------------------------------------
# Reference & test harness
# ---------------------------------------------------------------------------
def _reference_forward(x_nchw, weight_oihw, bias):
    """Pure-JAX reference: nearest 2x upsample + conv2d(pad=1), NCHW, f32."""
    x_up = jnp.repeat(jnp.repeat(x_nchw, 2, axis=2), 2, axis=3)
    y = jax.lax.conv_general_dilated(
        x_up, weight_oihw, window_strides=(1, 1),
        padding=((1, 1), (1, 1)),
        dimension_numbers=("NCHW", "OIHW", "NCHW"),
        precision=jax.lax.Precision.HIGHEST)
    return y + bias[None, :, None, None]


if __name__ == "__main__":
    key = jax.random.PRNGKey(0)
    k = jax.random.split(key, 6)

    fwd = jax.jit(upsample_forward,
                  static_argnames=("compute_dtype", "out_dtype", "row_tile", "cout_block"))

    # --- Config A: module defaults (channels=4, out_channels=4), x: (2,4,16,16).
    N, C, H, W = 2, 4, 16, 16
    Cout = C
    x = jax.random.normal(k[0], (N, C, H, W), dtype=jnp.float32)
    w = 0.1 * jax.random.normal(k[1], (Cout, C, 3, 3), dtype=jnp.float32)
    b = 0.1 * jax.random.normal(k[2], (Cout,), dtype=jnp.float32)
    ref = _reference_forward(x, w, b)

    # Exact-math path (f32 MXU inputs) validates the sub-pixel decomposition.
    out_f32 = jax.block_until_ready(
        fwd(x, w, b, compute_dtype=jnp.float32, out_dtype=jnp.float32))
    assert out_f32.shape == (N, Cout, 2 * H, 2 * W), out_f32.shape
    err = float(jnp.abs(out_f32 - ref).max())
    assert jnp.allclose(out_f32, ref, atol=1e-3, rtol=1e-3), err

    # Fast path: bf16 compute + bf16 writeback (memory-bound friendly output bytes).
    out_bf = jax.block_until_ready(fwd(x, w, b, out_dtype=jnp.bfloat16))
    assert out_bf.shape == (N, Cout, 2 * H, 2 * W), out_bf.shape
    err = float(jnp.abs(out_bf.astype(jnp.float32) - ref).max())
    assert jnp.allclose(out_bf.astype(jnp.float32), ref, atol=5e-2, rtol=5e-2), err

    # --- Config B: large Cout exercises the MXU path with Cout tiling (2x128 blocks).
    N2, C2, H2, W2, Cout2 = 1, 8, 16, 16, 256
    x2 = jax.random.normal(k[3], (N2, C2, H2, W2), dtype=jnp.float32)
    w2 = 0.05 * jax.random.normal(k[4], (Cout2, C2, 3, 3), dtype=jnp.float32)
    b2 = 0.05 * jax.random.normal(k[5], (Cout2,), dtype=jnp.float32)
    ref2 = _reference_forward(x2, w2, b2)
    out2 = jax.block_until_ready(
        fwd(x2, w2, b2, compute_dtype=jnp.float32, out_dtype=jnp.float32,
            cout_block=128))
    assert out2.shape == (N2, Cout2, 2 * H2, 2 * W2), out2.shape
    err2 = float(jnp.abs(out2 - ref2).max())
    assert jnp.allclose(out2, ref2, atol=1e-3, rtol=1e-3), err2

    print("KERNEL_OK")
</pallas_src>

<mosaic_0001>
module attributes {stable_mosaic.version = 11 : i64} {
  func.func @_upsample_packed_kernel(%arg0: i32, %arg1: i32, %arg2: memref<1x18x18x4xf32, #tpu.memory_space<vmem>>, %arg3: memref<9x4x16xf32, #tpu.memory_space<vmem>>, %arg4: memref<1x16xf32, #tpu.memory_space<vmem>>, %arg5: memref<1x16x16x16xf32, #tpu.memory_space<vmem>>) attributes {dimension_semantics = [#tpu.dimension_semantics<parallel>, #tpu.dimension_semantics<arbitrary>], iteration_bounds = array<i64: 2, 1>, scalar_prefetch = 0 : i64, scratch_operands = 0 : i64, tpu.core_type = #tpu.core_type<tc>, window_params = [{transform_indices = @transform_0, window_bounds = array<i64: 1, 18, 18, 4>}, {pipeline_mode = #tpu.pipeline_mode<synchronous>, transform_indices = @transform_1, window_bounds = array<i64: 9, 4, 16>}, {pipeline_mode = #tpu.pipeline_mode<synchronous>, transform_indices = @transform_2, window_bounds = array<i64: 1, 16>}, {transform_indices = @transform_3, window_bounds = array<i64: 1, 16, 16, 16>}]} {
    %c16_i32 = arith.constant 16 : i32
    %0 = arith.muli %arg1, %c16_i32 : i32
    %1 = tpu.assume_multiple %0, 8 : i32
    %c0 = arith.constant 0 : index
    %c0_0 = arith.constant 0 : index
    %2 = vector.load %arg4[%c0, %c0_0] : memref<1x16xf32, #tpu.memory_space<vmem>>, vector<1x16xf32>
    %3 = vector.shape_cast %2 : vector<1x16xf32> to vector<1x16xf32>
    %4 = vector.broadcast %3 : vector<1x16xf32> to vector<256x16xf32>
    %c0_1 = arith.constant 0 : index
    %5 = arith.index_cast %1 : i32 to index
    %c0_2 = arith.constant 0 : index
    %c0_3 = arith.constant 0 : index
    %6 = vector.load %arg2[%c0_1, %5, %c0_2, %c0_3] : memref<1x18x18x4xf32, #tpu.memory_space<vmem>>, vector<1x18x16x4xf32>
    %7 = vector.shape_cast %6 : vector<1x18x16x4xf32> to vector<18x16x4xf32>
    %8 = vector.extract_strided_slice %7 {offsets = [0, 0, 0], sizes = [16, 16, 4], strides = [1, 1, 1]} : vector<18x16x4xf32> to vector<16x16x4xf32>
    %9 = vector.shape_cast %8 : vector<16x16x4xf32> to vector<256x4xf32>
    %c0_4 = arith.constant 0 : index
    %c0_5 = arith.constant 0 : index
    %c0_6 = arith.constant 0 : index
    %10 = vector.load %arg3[%c0_4, %c0_5, %c0_6] : memref<9x4x16xf32, #tpu.memory_space<vmem>>, vector<1x4x16xf32>
    %11 = vector.shape_cast %10 : vector<1x4x16xf32> to vector<4x16xf32>
    %cst = arith.constant dense<0.000000e+00> : vector<256x16xf32>
    %12 = tpu.matmul %9, %11, %cst {dimension_numbers = #tpu.dot_dimension_numbers<[1], [0], [0], [1], [0, 0, 1, 1], [], []>} : vector<256x4xf32>, vector<4x16xf32>, vector<256x16xf32> -> vector<256x16xf32>
    %13 = arith.addf %4, %12 : vector<256x16xf32>
    %14 = vector.extract_strided_slice %7 {offsets = [1, 0, 0], sizes = [16, 16, 4], strides = [1, 1, 1]} : vector<18x16x4xf32> to vector<16x16x4xf32>
    %15 = vector.shape_cast %14 : vector<16x16x4xf32> to vector<256x4xf32>
    %c3 = arith.constant 3 : index
    %c0_7 = arith.constant 0 : index
    %c0_8 = arith.constant 0 : index
    %16 = vector.load %arg3[%c3, %c0_7, %c0_8] : memref<9x4x16xf32, #tpu.memory_space<vmem>>, vector<1x4x16xf32>
    %17 = vector.shape_cast %16 : vector<1x4x16xf32> to vector<4x16xf32>
    %cst_9 = arith.constant dense<0.000000e+00> : vector<256x16xf32>
    %18 = tpu.matmul %15, %17, %cst_9 {dimension_numbers = #tpu.dot_dimension_numbers<[1], [0], [0], [1], [0, 0, 1, 1], [], []>} : vector<256x4xf32>, vector<4x16xf32>, vector<256x16xf32> -> vector<256x16xf32>
    %19 = arith.addf %13, %18 : vector<256x16xf32>
    %20 = vector.extract_strided_slice %7 {offsets = [2, 0, 0], sizes = [16, 16, 4], strides = [1, 1, 1]} : vector<18x16x4xf32> to vector<16x16x4xf32>
    %21 = vector.shape_cast %20 : vector<16x16x4xf32> to vector<256x4xf32>
    %c6 = arith.constant 6 : index
    %c0_10 = arith.constant 0 : index
    %c0_11 = arith.constant 0 : index
    %22 = vector.load %arg3[%c6, %c0_10, %c0_11] : memref<9x4x16xf32, #tpu.memory_space<vmem>>, vector<1x4x16xf32>
    %23 = vector.shape_cast %22 : vector<1x4x16xf32> to vector<4x16xf32>
    %cst_12 = arith.constant dense<0.000000e+00> : vector<256x16xf32>
    %24 = tpu.matmul %21, %23, %cst_12 {dimension_numbers = #tpu.dot_dimension_numbers<[1], [0], [0], [1], [0, 0, 1, 1], [], []>} : vector<256x4xf32>, vector<4x16xf32>, vector<256x16xf32> -> vector<256x16xf32>
    %25 = arith.addf %19, %24 : vector<256x16xf32>
    %c0_13 = arith.constant 0 : index
    %26 = arith.index_cast %1 : i32 to index
    %c1 = arith.constant 1 : index
    %c0_14 = arith.constant 0 : index
    %27 = vector.load %arg2[%c0_13, %26, %c1, %c0_14] : memref<1x18x18x4xf32, #tpu.memory_space<vmem>>, vector<1x18x16x4xf32>
    %28 = vector.shape_cast %27 : vector<1x18x16x4xf32> to vector<18x16x4xf32>
    %29 = vector.extract_strided_slice %28 {offsets = [0, 0, 0], sizes = [16, 16, 4], strides = [1, 1, 1]} : vector<18x16x4xf32> to vector<16x16x4xf32>
    %30 = vector.shape_cast %29 : vector<16x16x4xf32> to vector<256x4xf32>
    %c1_15 = arith.constant 1 : index
    %c0_16 = arith.constant 0 : index
    %c0_17 = arith.constant 0 : index
    %31 = vector.load %arg3[%c1_15, %c0_16, %c0_17] : memref<9x4x16xf32, #tpu.memory_space<vmem>>, vector<1x4x16xf32>
    %32 = vector.shape_cast %31 : vector<1x4x16xf32> to vector<4x16xf32>
    %cst_18 = arith.constant dense<0.000000e+00> : vector<256x16xf32>
    %33 = tpu.matmul %30, %32, %cst_18 {dimension_numbers = #tpu.dot_dimension_numbers<[1], [0], [0], [1], [0, 0, 1, 1], [], []>} : vector<256x4xf32>, vector<4x16xf32>, vector<256x16xf32> -> vector<256x16xf32>
    %34 = arith.addf %25, %33 : vector<256x16xf32>
    %35 = vector.extract_strided_slice %28 {offsets = [1, 0, 0], sizes = [16, 16, 4], strides = [1, 1, 1]} : vector<18x16x4xf32> to vector<16x16x4xf32>
    %36 = vector.shape_cast %35 : vector<16x16x4xf32> to vector<256x4xf32>
    %c4 = arith.constant 4 : index
    %c0_19 = arith.constant 0 : index
    %c0_20 = arith.constant 0 : index
    %37 = vector.load %arg3[%c4, %c0_19, %c0_20] : memref<9x4x16xf32, #tpu.memory_space<vmem>>, vector<1x4x16xf32>
    %38 = vector.shape_cast %37 : vector<1x4x16xf32> to vector<4x16xf32>
    %cst_21 = arith.constant dense<0.000000e+00> : vector<256x16xf32>
    %39 = tpu.matmul %36, %38, %cst_21 {dimension_numbers = #tpu.dot_dimension_numbers<[1], [0], [0], [1], [0, 0, 1, 1], [], []>} : vector<256x4xf32>, vector<4x16xf32>, vector<256x16xf32> -> vector<256x16xf32>
    %40 = arith.addf %34, %39 : vector<256x16xf32>
    %41 = vector.extract_strided_slice %28 {offsets = [2, 0, 0], sizes = [16, 16, 4], strides = [1, 1, 1]} : vector<18x16x4xf32> to vector<16x16x4xf32>
    %42 = vector.shape_cast %41 : vector<16x16x4xf32> to vector<256x4xf32>
    %c7 = arith.constant 7 : index
    %c0_22 = arith.constant 0 : index
    %c0_23 = arith.constant 0 : index
    %43 = vector.load %arg3[%c7, %c0_22, %c0_23] : memref<9x4x16xf32, #tpu.memory_space<vmem>>, vector<1x4x16xf32>
    %44 = vector.shape_cast %43 : vector<1x4x16xf32> to vector<4x16xf32>
    %cst_24 = arith.constant dense<0.000000e+00> : vector<256x16xf32>
    %45 = tpu.matmul %42, %44, %cst_24 {dimension_numbers = #tpu.dot_dimension_numbers<[1], [0], [0], [1], [0, 0, 1, 1], [], []>} : vector<256x4xf32>, vector<4x16xf32>, vector<256x16xf32> -> vector<256x16xf32>
    %46 = arith.addf %40, %45 : vector<256x16xf32>
    %c0_25 = arith.constant 0 : index
    %47 = arith.index_cast %1 : i32 to index
    %c2 = arith.constant 2 : index
    %c0_26 = arith.constant 0 : index
    %48 = vector.load %arg2[%c0_25, %47, %c2, %c0_26] : memref<1x18x18x4xf32, #tpu.memory_space<vmem>>, vector<1x18x16x4xf32>
    %49 = vector.shape_cast %48 : vector<1x18x16x4xf32> to vector<18x16x4xf32>
    %50 = vector.extract_strided_slice %49 {offsets = [0, 0, 0], sizes = [16, 16, 4], strides = [1, 1, 1]} : vector<18x16x4xf32> to vector<16x16x4xf32>
    %51 = vector.shape_cast %50 : vector<16x16x4xf32> to vector<256x4xf32>
    %c2_27 = arith.constant 2 : index
    %c0_28 = arith.constant 0 : index
    %c0_29 = arith.constant 0 : index
    %52 = vector.load %arg3[%c2_27, %c0_28, %c0_29] : memref<9x4x16xf32, #tpu.memory_space<vmem>>, vector<1x4x16xf32>
    %53 = vector.shape_cast %52 : vector<1x4x16xf32> to vector<4x16xf32>
    %cst_30 = arith.constant dense<0.000000e+00> : vector<256x16xf32>
    %54 = tpu.matmul %51, %53, %cst_30 {dimension_numbers = #tpu.dot_dimension_numbers<[1], [0], [0], [1], [0, 0, 1, 1], [], []>} : vector<256x4xf32>, vector<4x16xf32>, vector<256x16xf32> -> vector<256x16xf32>
    %55 = arith.addf %46, %54 : vector<256x16xf32>
    %56 = vector.extract_strided_slice %49 {offsets = [1, 0, 0], sizes = [16, 16, 4], strides = [1, 1, 1]} : vector<18x16x4xf32> to vector<16x16x4xf32>
    %57 = vector.shape_cast %56 : vector<16x16x4xf32> to vector<256x4xf32>
    %c5 = arith.constant 5 : index
    %c0_31 = arith.constant 0 : index
    %c0_32 = arith.constant 0 : index
    %58 = vector.load %arg3[%c5, %c0_31, %c0_32] : memref<9x4x16xf32, #tpu.memory_space<vmem>>, vector<1x4x16xf32>
    %59 = vector.shape_cast %58 : vector<1x4x16xf32> to vector<4x16xf32>
    %cst_33 = arith.constant dense<0.000000e+00> : vector<256x16xf32>
    %60 = tpu.matmul %57, %59, %cst_33 {dimension_numbers = #tpu.dot_dimension_numbers<[1], [0], [0], [1], [0, 0, 1, 1], [], []>} : vector<256x4xf32>, vector<4x16xf32>, vector<256x16xf32> -> vector<256x16xf32>
    %61 = arith.addf %55, %60 : vector<256x16xf32>
    %62 = vector.extract_strided_slice %49 {offsets = [2, 0, 0], sizes = [16, 16, 4], strides = [1, 1, 1]} : vector<18x16x4xf32> to vector<16x16x4xf32>
    %63 = vector.shape_cast %62 : vector<16x16x4xf32> to vector<256x4xf32>
    %c8 = arith.constant 8 : index
    %c0_34 = arith.constant 0 : index
    %c0_35 = arith.constant 0 : index
    %64 = vector.load %arg3[%c8, %c0_34, %c0_35] : memref<9x4x16xf32, #tpu.memory_space<vmem>>, vector<1x4x16xf32>
    %65 = vector.shape_cast %64 : vector<1x4x16xf32> to vector<4x16xf32>
    %cst_36 = arith.constant dense<0.000000e+00> : vector<256x16xf32>
    %66 = tpu.matmul %63, %65, %cst_36 {dimension_numbers = #tpu.dot_dimension_numbers<[1], [0], [0], [1], [0, 0, 1, 1], [], []>} : vector<256x4xf32>, vector<4x16xf32>, vector<256x16xf32> -> vector<256x16xf32>
    %67 = arith.addf %61, %66 : vector<256x16xf32>
    %68 = vector.shape_cast %67 : vector<256x16xf32> to vector<16x16x16xf32>
    %c0_37 = arith.constant 0 : index
    %c0_38 = arith.constant 0 : index
    %c0_39 = arith.constant 0 : index
    %c0_40 = arith.constant 0 : index
    %69 = vector.load %arg5[%c0_37, %c0_38, %c0_39, %c0_40] : memref<1x16x16x16xf32, #tpu.memory_space<vmem>>, vector<1x16x16x16xf32>
    %70 = vector.shape_cast %69 : vector<1x16x16x16xf32> to vector<16x16x16xf32>
    %71 = vector.shape_cast %68 : vector<16x16x16xf32> to vector<1x16x16x16xf32>
    tpu.vector_store %arg5[%c0_37, %c0_38, %c0_39, %c0_40], %71 {strides = array<i32>} : memref<1x16x16x16xf32, #tpu.memory_space<vmem>>, vector<1x16x16x16xf32>,
    return
  }
  func.func @transform_0(%arg0: i32, %arg1: i32) -> (i32, i32, i32, i32) {
    %c0_i32 = arith.constant 0 : i32
    %c0_i32_0 = arith.constant 0 : i32
    %c0_i32_1 = arith.constant 0 : i32
    %c0_i32_2 = arith.constant 0 : i32
    return %arg0, %c0_i32, %c0_i32_0, %c0_i32_1 : i32, i32, i32, i32
  }
  func.func @transform_1(%arg0: i32, %arg1: i32) -> (i32, i32, i32) {
    %c0_i32 = arith.constant 0 : i32
    %c0_i32_0 = arith.constant 0 : i32
    %c0_i32_1 = arith.constant 0 : i32
    %c0_i32_2 = arith.constant 0 : i32
    return %c0_i32, %c0_i32_0, %c0_i32_1 : i32, i32, i32
  }
  func.func @transform_2(%arg0: i32, %arg1: i32) -> (i32, i32) {
    %c0_i32 = arith.constant 0 : i32
    %c0_i32_0 = arith.constant 0 : i32
    %c0_i32_1 = arith.constant 0 : i32
    return %c0_i32, %c0_i32_0 : i32, i32
  }
  func.func @transform_3(%arg0: i32, %arg1: i32) -> (i32, i32, i32, i32) {
    %c0_i32 = arith.constant 0 : i32
    %c0_i32_0 = arith.constant 0 : i32
    %c0_i32_1 = arith.constant 0 : i32
    return %arg0, %arg1, %c0_i32, %c0_i32_0 : i32, i32, i32, i32
  }
}

</mosaic_0001>

<bundles_post_ra>
// kernel: tile.9
= control target key start
LH: loop header
LB: loop body
LE: loop exit
PB: predicated region body
PF: predicated region fallthrough
CT: control target
= control target key end

     0   :  { %vm8_vm0 = vcmask 31744   ;;  %s40_s8 = smov 4   ;;  %s41_s9 = smov 8   ;;  %vm14_vm1 = vcmask 130144   ;;  %vm20_vm2 = vcmask 97344   ;;  %vm26_vm3 = vcmask 64544   ;;  %s58_s0 = inlined_call_operand.vmem [shape: f32[4,4], index: 0, kind: input, shape index: {}]   ;;  %s59_s1 = inlined_call_operand.vmem [shape: f32[1,16], index: 1, kind: output, shape index: {}]  }
   0x1   :  { %v5_v0 = vld [vmem:[%s58_s0] sm:$0xf]  ;;  %s39_s0 = smov 12  }
   0x2   :  { %6 = vst [vmem:[#allocation1] sm:$0xf] %v5_v0 }
   0x9   :  { %v11_v1 = vld [vmem:[#allocation1 + $0x3] sm:$0x1]   ;;  %v23_v2 = vld [vmem:[#allocation1 + $0x1] sm:$0x1]   ;;  %v7_v3 = vld [vmem:[#allocation1] sm:$0x1]  }
   0xa   :  { %12 = vrot.lane.b32.xlu0 %v11_v1, %s39_s0  ;;  %24 = vrot.lane.b32.xlu1 %v23_v2, %s40_s8  ;;  %v17_v4 = vld [vmem:[#allocation1 + $0x2] sm:$0x1]   ;;  %9 = vst.msk [vmem:[#allocation0] sm:$0x1] %vm8_vm0, %v7_v3  }
   0xe   :  { %18 = vrot.lane.b32.xlu0 %v17_v4, %s41_s9 }
  0x7c   :  { %v13_v5 = vpop.permute.xlu0 %12   ;;  %v25_v6 = vpop.permute.xlu1 %24  }
  0x7d   :  { %15 = vst.msk [vmem:[#allocation0] sm:$0x1] %vm14_vm1, %v13_v5  }
  0x80   :  { %v19_v7 = vpop.permute.xlu0 %18  }
  0x81   :  { %21 = vst.msk [vmem:[#allocation0] sm:$0x1] %vm20_vm2, %v19_v7  }
  0x82   :  { %27 = vst.msk [vmem:[#allocation0] sm:$0x1] %vm26_vm3, %v25_v6  }
  0x89   :  { %v32_v8 = vld [vmem:[#allocation0] sm:$0x1] }
  0x8a   :  { %35 = vst [vmem:[%s59_s1] sm:$0x1] %v32_v8 }

// kernel: tile.8
= control target key start
LH: loop header
LB: loop body
LE: loop exit
PB: predicated region body
PF: predicated region fallthrough
CT: control target
= control target key end

     0   :  { %s22_s0 = inlined_call_operand.vmem [shape: f32[4], index: 0, kind: input, shape index: {}]   ;;  %s23_s1 = inlined_call_operand.vmem [shape: f32[4,4], index: 1, kind: output, shape index: {}]  }
   0x1   :  { %v4_v0 = vld [vmem:[%s22_s0] ss:$0 sm:$0xff] }
   0x2   :  { %5 = vst [vmem:[%s23_s1] sm:$0xf] %v4_v0 }

// kernel: upsample_forward.1
= control target key start
LH: loop header
LB: loop body
LE: loop exit
PB: predicated region body
PF: predicated region fallthrough
CT: control target
= control target key end

     0   :  { %s4254_s12 = smov 0   ;;  %s4256_s13 = smov 0   ;;  %s5717_s0 = inlined_call_operand.vmem [shape: f32[2,18,18,4], index: 0, kind: input, shape index: {}]   ;;  %s5718_s1 = inlined_call_operand.vmem [shape: f32[9,4,16], index: 1, kind: input, shape index: {}]   ;;  %s5719_s2 = inlined_call_operand.vmem [shape: f32[1,16], index: 2, kind: input, shape index: {}]   ;;  %s5720_s3 = inlined_call_operand.vmem [shape: f32[2,16,16,16], index: 3, kind: output, shape index: {}]  }
   0x1   :  { %s4258_s14 = smov 0  }
   0x2 LB: > { %s25_s15 = sadd.s32 1, %s4228_s13  ;;  %p3123_p0 = scmp.ge.s32.totalorder %s4232_s14, 1  ;;  %s4232_s14 = sphi %s4258_s14, %s13_s14   ;;  %s4228_s13 = sphi %s4256_s13, %s5824_s13   ;;  %s4224_s12 = sphi %s4254_s12, %s5823_s12  }
   0x3   : > { %p27_p1 = scmp.ge.s32.totalorder %s25_s15, 2  ;;  %p151_p2 = scmp.lt.s32.totalorder %s4232_s14, 3 }
   0x5   : > { %s5826_s15 = smov (%p27_p1, %s25_s15), 0  ;;  %p152_p3 = pnand %p3123_p0, %p151_p2 }
   0x7   : > { %155 = sbr.rel (%p152_p3) target bundleno = 505 (0x1f9), region = 32 }
   0xc   : > { %v242_v0 = vld [vmem:[%s5718_s1] sm:$0xf]  ;;  %vm340_vm0 = vcmask 1043456   ;;  %p180_p4 = scmp.lt.s32.totalorder %s4224_s12, 1  ;;  %v3161_v1 = vld [vmem:[%s5718_s1 + $0xc] sm:$0xf] }
   0xd   : > { %4183 = vmatprep.subr.msk.mxu1 %vm340_vm0, %v242_v0  ;;  %3733 = vmatprep.subr.msk.mxu0 %vm340_vm0, %v242_v0  ;;  %v3195_v2 = vld [vmem:[%s5718_s1 + $0x18] sm:$0xf]  ;;  %vm243_vm1 = vcmask 31744   ;;  %v4318_v9 = vld [vmem:[%s5718_s1 + $0x4] sm:$0xf]  ;;  %vm2997_vm2 = vcmask 130048  }
   0xe   : > { %4184 = vmatpush3.msk.msra.mxu1 %vm340_vm0, %v242_v0  ;;  %3734 = vmatpush3.msk.msra.mxu0 %vm340_vm0, %v242_v0  ;;  %s5828_s12 = smov (!%p180_p4, %s4224_s12), 1  ;;  %v4323_v10 = vld [vmem:[%s5718_s1 + $0x10] sm:$0xf]  ;;  %v4434_v37 = vld [vmem:[%s5718_s1 + $0x1c] sm:$0xf] }
   0xf   : > { %3783 = vmatprep.subr.msk.mxu1 %vm340_vm0, %v3161_v1  ;;  %3833 = vmatprep.subr.msk.mxu0 %vm340_vm0, %v3195_v2  ;;  %s4185_s22 = smul.u32 432, %s5828_s12  ;;  %v4439_v38 = vld [vmem:[%s5718_s1 + $0x8] sm:$0xf]  ;;  %v4559_v48 = vld [vmem:[%s5718_s1 + $0x14] sm:$0xf]  ;;  %s3435_s17 = sshll.u32 %s5828_s12, 8 }
  0x10   : > { %v4564_v49 = vld [vmem:[%s5718_s1 + $0x20] sm:$0xf]  ;;  %s5556_s20 = scalar_lea.vmem %s5720_s3, %s3435_s17 }
  0x11   : > { %s4293_s25 = scalar_lea.vmem %s5717_s0, %s4185_s22 }
  0x12   : > { %v206_v3 = vld [vmem:[%s4293_s25] sm:$0xff]  ;;  %v207_v5 = vld [vmem:[%s4293_s25 + $0x8] sm:$0xff]  ;;  %v4307_v7 = vld [vmem:[%s4293_s25 + $0x18] sm:$0xff] }
  0x13   : > { %v4297_v4 = vld [vmem:[%s4293_s25 + $0xc0] sm:$0xff]  ;;  %3735 = vmatprep.mubr.msk.f32.mxu0 %vm243_vm1, %v206_v3  ;;  %v4304_v6 = vld [vmem:[%s4293_s25 + $0xc8] sm:$0xff]  ;;  %v4310_v8 = vld [vmem:[%s4293_s25 + $0xd8] sm:$0xff] }
  0x14   : > { %3759 = vmatprep.mubr.msk.f32.mxu1 %vm243_vm1, %v4297_v4  ;;  %3736 = vmatmul.mubr.msk.f32.vlgmr.msra.gmra.mxu0 %vm243_vm1, %v207_v5  ;;  %v209_v11 = vld [vmem:[%s4293_s25 + $0x20] sm:$0xff]  ;;  %v210_v13 = vld [vmem:[%s4293_s25 + $0x30] sm:$0xff]  ;;  %v211_v15 = vld [vmem:[%s4293_s25 + $0x38] sm:$0xff] }
  0x15   : > { %3760 = vmatmul.mubr.msk.f32.vlgmr.msra.gmra.mxu1 %vm243_vm1, %v4304_v6  ;;  %3834 = vmatpush3.msk.msra.mxu0 %vm340_vm0, %v3195_v2  ;;  %v4329_v12 = vld [vmem:[%s4293_s25 + $0xe0] sm:$0xff]  ;;  %v4337_v14 = vld [vmem:[%s4293_s25 + $0xf0] sm:$0xff]  ;;  %v4351_v16 = vld [vmem:[%s4293_s25 + $0xf8] sm:$0xff] }
  0x16   : > { %3784 = vmatpush3.msk.msra.mxu1 %vm340_vm0, %v3161_v1  ;;  %3738 = vmatprep.mubr.msk.f32.mxu0 %vm243_vm1, %v4307_v7  ;;  %v212_v17 = vld [vmem:[%s4293_s25 + $0x48] sm:$0xff]  ;;  %v213_v19 = vld [vmem:[%s4293_s25 + $0x50] sm:$0xff]  ;;  %v214_v21 = vld [vmem:[%s4293_s25 + $0x60] sm:$0xff] }
  0x17   : > { %3762 = vmatprep.mubr.msk.f32.mxu1 %vm243_vm1, %v4310_v8  ;;  %3883 = vmatprep.subr.msk.mxu1 %vm340_vm0, %v4318_v9  ;;  %v4355_v18 = vld [vmem:[%s4293_s25 + $0x108] sm:$0xff]  ;;  %v4365_v20 = vld [vmem:[%s4293_s25 + $0x110] sm:$0xff]  ;;  %v4369_v22 = vld [vmem:[%s4293_s25 + $0x120] sm:$0xff] }
  0x18   : > { %3933 = vmatprep.subr.msk.mxu0 %vm340_vm0, %v4323_v10  ;;  %3739 = vmatmul.mubr.msk.f32.gmra.mxu0 %vm243_vm1, %v209_v11  ;;  %v215_v23 = vld [vmem:[%s4293_s25 + $0x68] sm:$0xff]  ;;  %v216_v25 = vld [vmem:[%s4293_s25 + $0x78] sm:$0xff]  ;;  %v217_v27 = vld [vmem:[%s4293_s25 + $0x80] sm:$0xff] }
  0x19   : > { %3763 = vmatmul.mubr.msk.f32.gmra.mxu1 %vm243_vm1, %v4329_v12  ;;  %3741 = vmatprep.mubr.msk.f32.mxu0 %vm243_vm1, %v210_v13  ;;  %v4379_v24 = vld [vmem:[%s4293_s25 + $0x128] sm:$0xff]  ;;  %v4383_v26 = vld [vmem:[%s4293_s25 + $0x138] sm:$0xff]  ;;  %v4393_v28 = vld [vmem:[%s4293_s25 + $0x140] sm:$0xff] }
  0x1a   : > { %3765 = vmatprep.mubr.msk.f32.mxu1 %vm243_vm1, %v4337_v14  ;;  %v218_v29 = vld [vmem:[%s4293_s25 + $0x90] sm:$0xff]  ;;  %v219_v31 = vld [vmem:[%s4293_s25 + $0x98] sm:$0xff]  ;;  %v220_v33 = vld [vmem:[%s4293_s25 + $0xa8] sm:$0xff] }
  0x1b   : > { %v4397_v30 = vld [vmem:[%s4293_s25 + $0x150] sm:$0xff]  ;;  %v4407_v32 = vld [vmem:[%s4293_s25 + $0x158] sm:$0xff]  ;;  %v4411_v34 = vld [vmem:[%s4293_s25 + $0x168] sm:$0xff] }
  0x1c   : > { %3742 = vmatmul.mubr.msk.f32.gmra.mxu0 %vm243_vm1, %v211_v15  ;;  %v221_v35 = vld [vmem:[%s4293_s25 + $0xb0] sm:$0xff]  ;;  %v238_v39 = vld [vmem:[%s4293_s25 + $0x180] sm:$0xff]  ;;  %v239_v40 = vld [vmem:[%s4293_s25 + $0x188] sm:$0xff] }
  0x1d   : > { %3766 = vmatmul.mubr.msk.f32.gmra.mxu1 %vm243_vm1, %v4351_v16  ;;  %3744 = vmatprep.mubr.msk.f32.mxu0 %vm243_vm1, %v212_v17  ;;  %v4421_v36 = vld [vmem:[%s4293_s25 + $0x170] sm:$0xff]  ;;  %v240_v41 = vld [vmem:[%s4293_s25 + $0x198] sm:$0xff]  ;;  %v241_v42 = vld [vmem:[%s4293_s25 + $0x1a0] sm:$0xff] }
  0x1e   : > { %3768 = vmatprep.mubr.msk.f32.mxu1 %vm243_vm1, %v4355_v18  ;;  %v1137_v43 = vld [vmem:[%s4293_s25 + $0x1] sm:$0xff]  ;;  %v1139_v44 = vld [vmem:[%s4293_s25 + $0x19] sm:$0xff]  ;;  %v1138_v45 = vld [vmem:[%s4293_s25 + $0x9] sm:$0xff] }
  0x1f   : > { %v1140_v46 = vld [vmem:[%s4293_s25 + $0x21] sm:$0xff]  ;;  %v4552_v47 = vld [vmem:[%s4293_s25 + $0x31] sm:$0xff]  ;;  %v4571_v50 = vld [vmem:[%s4293_s25 + $0x39] sm:$0xff] }
  0x20   : > { %3745 = vmatmul.mubr.msk.f32.gmra.mxu0 %vm243_vm1, %v213_v19  ;;  %v4577_v51 = vld [vmem:[%s4293_s25 + $0x49] sm:$0xff]  ;;  %v4591_v52 = vld [vmem:[%s4293_s25 + $0x51] sm:$0xff]  ;;  %v4594_v53 = vld [vmem:[%s4293_s25 + $0x61] sm:$0xff] }
  0x21   : > { %3769 = vmatmul.mubr.msk.f32.gmra.mxu1 %vm243_vm1, %v4365_v20  ;;  %3747 = vmatprep.mubr.msk.f32.mxu0 %vm243_vm1, %v214_v21  ;;  %v4605_v54 = vld [vmem:[%s4293_s25 + $0x69] sm:$0xff]  ;;  %v4608_v55 = vld [vmem:[%s4293_s25 + $0x79] sm:$0xff]  ;;  %v4619_v56 = vld [vmem:[%s4293_s25 + $0x81] sm:$0xff] }
  0x22   : > { %3771 = vmatprep.mubr.msk.f32.mxu1 %vm243_vm1, %v4369_v22  ;;  %v4622_v57 = vld [vmem:[%s4293_s25 + $0x91] sm:$0xff]  ;;  %v4633_v58 = vld [vmem:[%s4293_s25 + $0x99] sm:$0xff]  ;;  %v4636_v59 = vld [vmem:[%s4293_s25 + $0xa9] sm:$0xff] }
  0x23   : > { %v4647_v60 = vld [vmem:[%s4293_s25 + $0xb1] sm:$0xff]  ;;  %v4650_v61 = vld [vmem:[%s4293_s25 + $0xc1] sm:$0xff]  ;;  %v4661_v62 = vld [vmem:[%s4293_s25 + $0xc9] sm:$0xff] }
  0x24   : > { %3748 = vmatmul.mubr.msk.f32.gmra.mxu0 %vm243_vm1, %v215_v23  ;;  %v4664_v63 = vld [vmem:[%s4293_s25 + $0xd9] sm:$0xff]  ;;  %v4675_v0 = vld [vmem:[%s4293_s25 + $0xe1] sm:$0xff]  ;;  %v4678_v1 = vld [vmem:[%s4293_s25 + $0xf1] sm:$0xff] }
  0x25   : > { %3772 = vmatmul.mubr.msk.f32.gmra.mxu1 %vm243_vm1, %v4379_v24  ;;  %3750 = vmatprep.mubr.msk.f32.mxu0 %vm243_vm1, %v216_v25  ;;  %v4689_v2 = vld [vmem:[%s4293_s25 + $0xf9] sm:$0xff]  ;;  %v4692_v3 = vld [vmem:[%s4293_s25 + $0x109] sm:$0xff]  ;;  %v4706_v5 = vld [vmem:[%s4293_s25 + $0x121] sm:$0xff] }
  0x26   : > { %3774 = vmatprep.mubr.msk.f32.mxu1 %vm243_vm1, %v4383_v26 }
  0x28   : > { %3751 = vmatmul.mubr.msk.f32.gmra.mxu0 %vm243_vm1, %v217_v27 }
  0x29   : > { %3775 = vmatmul.mubr.msk.f32.gmra.mxu1 %vm243_vm1, %v4393_v28  ;;  %3753 = vmatprep.mubr.msk.f32.mxu0 %vm243_vm1, %v218_v29 }
  0x2a   : > { %3777 = vmatprep.mubr.msk.f32.mxu1 %vm243_vm1, %v4397_v30 }
  0x2c   : > { %3754 = vmatmul.mubr.msk.f32.gmra.mxu0 %vm243_vm1, %v219_v31 }
  0x2d   : > { %3778 = vmatmul.mubr.msk.f32.gmra.mxu1 %vm243_vm1, %v4407_v32  ;;  %3756 = vmatprep.mubr.msk.f32.mxu0 %vm243_vm1, %v220_v33 }
  0x2e   : > { %3780 = vmatprep.mubr.msk.f32.mxu1 %vm243_vm1, %v4411_v34 }
  0x30   : > { %3757 = vmatmul.mubr.msk.f32.gmra.mxu0 %vm243_vm1, %v221_v35 }
  0x31   : > { %3781 = vmatmul.mubr.msk.f32.gmra.mxu1 %vm243_vm1, %v4421_v36  ;;  %3835 = vmatprep.mubr.msk.f32.mxu0 %vm243_vm1, %v210_v13 }
  0x32   : > { %3785 = vmatprep.mubr.msk.f32.mxu1 %vm243_vm1, %v4307_v7  ;;  %v4720_v7 = vld [vmem:[%s4293_s25 + $0x139] sm:$0xff] }
  0x34   : > { %3836 = vmatmul.mubr.msk.f32.vlgmr.msra.gmra.mxu0 %vm243_vm1, %v211_v15 }
  0x35   : > { %3786 = vmatmul.mubr.msk.f32.vlgmr.msra.gmra.mxu1 %vm243_vm1, %v209_v11  ;;  %3934 = vmatpush3.msk.msra.mxu0 %vm340_vm0, %v4323_v10  ;;  %v4745_v10 = vld [vmem:[%s4293_s25 + $0x159] sm:$0xff]  ;;  %v4748_v11 = vld [vmem:[%s4293_s25 + $0x169] sm:$0xff] }
  0x36   : > { %3884 = vmatpush3.msk.msra.mxu1 %vm340_vm0, %v4318_v9  ;;  %3788 = vmatprep.mubr.msk.f32.mxu1 %vm243_vm1, %v210_v13  ;;  %v4734_v9 = vld [vmem:[%s4293_s25 + $0x151] sm:$0xff]  ;;  %v4762_v13 = vld [vmem:[%s4293_s25 + $0x181] sm:$0xff] }
  0x37   : > { %3838 = vmatprep.mubr.msk.f32.mxu0 %vm243_vm1, %v212_v17  ;;  %3983 = vmatprep.subr.msk.mxu1 %vm340_vm0, %v4434_v37 }
  0x38   : > { %4033 = vmatprep.subr.msk.mxu0 %vm340_vm0, %v4439_v38  ;;  %3839 = vmatmul.mubr.msk.f32.gmra.mxu0 %vm243_vm1, %v213_v19 }
  0x39   : > { %3789 = vmatmul.mubr.msk.f32.gmra.mxu1 %vm243_vm1, %v211_v15  ;;  %3841 = vmatprep.mubr.msk.f32.mxu0 %vm243_vm1, %v214_v21  ;;  %v2067_v15 = vld [vmem:[%s4293_s25 + $0x2] sm:$0xff] }
  0x3a   : > { %3791 = vmatprep.mubr.msk.f32.mxu1 %vm243_vm1, %v212_v17  ;;  %v4785_v17 = vld [vmem:[%s4293_s25 + $0x1a] sm:$0xff] }
  0x3c   : > { %3842 = vmatmul.mubr.msk.f32.gmra.mxu0 %vm243_vm1, %v215_v23 }
  0x3d   : > { %3792 = vmatmul.mubr.msk.f32.gmra.mxu1 %vm243_vm1, %v213_v19  ;;  %3844 = vmatprep.mubr.msk.f32.mxu0 %vm243_vm1, %v216_v25  ;;  %v4802_v19 = vld [vmem:[%s4293_s25 + $0x32] sm:$0xff] }
  0x3e   : > { %3794 = vmatprep.mubr.msk.f32.mxu1 %vm243_vm1, %v214_v21  ;;  %v4816_v21 = vld [vmem:[%s4293_s25 + $0x4a] sm:$0xff] }
  0x40   : > { %3845 = vmatmul.mubr.msk.f32.gmra.mxu0 %vm243_vm1, %v217_v27 }
  0x41   : > { %3795 = vmatmul.mubr.msk.f32.gmra.mxu1 %vm243_vm1, %v215_v23  ;;  %3847 = vmatprep.mubr.msk.f32.mxu0 %vm243_vm1, %v218_v29  ;;  %v4830_v23 = vld [vmem:[%s4293_s25 + $0x62] sm:$0xff] }
  0x42   : > { %3797 = vmatprep.mubr.msk.f32.mxu1 %vm243_vm1, %v216_v25  ;;  %v4844_v25 = vld [vmem:[%s4293_s25 + $0x7a] sm:$0xff] }
  0x44   : > { %3848 = vmatmul.mubr.msk.f32.gmra.mxu0 %vm243_vm1, %v219_v31 }
  0x45   : > { %3798 = vmatmul.mubr.msk.f32.gmra.mxu1 %vm243_vm1, %v217_v27  ;;  %3850 = vmatprep.mubr.msk.f32.mxu0 %vm243_vm1, %v220_v33  ;;  %v4858_v27 = vld [vmem:[%s4293_s25 + $0x92] sm:$0xff] }
  0x46   : > { %3800 = vmatprep.mubr.msk.f32.mxu1 %vm243_vm1, %v218_v29  ;;  %v4872_v29 = vld [vmem:[%s4293_s25 + $0xaa] sm:$0xff] }
  0x48   : > { %3851 = vmatmul.mubr.msk.f32.gmra.mxu0 %vm243_vm1, %v221_v35 }
  0x49   : > { %3801 = vmatmul.mubr.msk.f32.gmra.mxu1 %vm243_vm1, %v219_v31  ;;  %3853 = vmatprep.mubr.msk.f32.mxu0 %vm243_vm1, %v4297_v4  ;;  %v4886_v31 = vld [vmem:[%s4293_s25 + $0xc2] sm:$0xff] }
  0x4a   : > { %3803 = vmatprep.mubr.msk.f32.mxu1 %vm243_vm1, %v220_v33  ;;  %v4900_v33 = vld [vmem:[%s4293_s25 + $0xda] sm:$0xff] }
  0x4c   : > { %3854 = vmatmul.mubr.msk.f32.gmra.mxu0 %vm243_vm1, %v4304_v6 }
  0x4d   : > { %3804 = vmatmul.mubr.msk.f32.gmra.mxu1 %vm243_vm1, %v221_v35  ;;  %3856 = vmatprep.mubr.msk.f32.mxu0 %vm243_vm1, %v4310_v8 }
  0x4e   : > { %3806 = vmatprep.mubr.msk.f32.mxu1 %vm243_vm1, %v4297_v4  ;;  %v4703_v4 = vld [vmem:[%s4293_s25 + $0x111] sm:$0xff] }
  0x50   : > { %3857 = vmatmul.mubr.msk.f32.gmra.mxu0 %vm243_vm1, %v4329_v12 }
  0x51   : > { %3807 = vmatmul.mubr.msk.f32.gmra.mxu1 %vm243_vm1, %v4304_v6  ;;  %3859 = vmatprep.mubr.msk.f32.mxu0 %vm243_vm1, %v4337_v14  ;;  %v4717_v6 = vld [vmem:[%s4293_s25 + $0x129] sm:$0xff] }
  0x52   : > { %3809 = vmatprep.mubr.msk.f32.mxu1 %vm243_vm1, %v4310_v8  ;;  %v4731_v8 = vld [vmem:[%s4293_s25 + $0x141] sm:$0xff] }
  0x54   : > { %3860 = vmatmul.mubr.msk.f32.gmra.mxu0 %vm243_vm1, %v4351_v16 }
  0x55   : > { %3810 = vmatmul.mubr.msk.f32.gmra.mxu1 %vm243_vm1, %v4329_v12  ;;  %3862 = vmatprep.mubr.msk.f32.mxu0 %vm243_vm1, %v4355_v18  ;;  %v4759_v12 = vld [vmem:[%s4293_s25 + $0x171] sm:$0xff] }
  0x56   : > { %3812 = vmatprep.mubr.msk.f32.mxu1 %vm243_vm1, %v4337_v14  ;;  %v4773_v14 = vld [vmem:[%s4293_s25 + $0x189] sm:$0xff] }
  0x58   : > { %3863 = vmatmul.mubr.msk.f32.gmra.mxu0 %vm243_vm1, %v4365_v20 }
  0x59   : > { %3813 = vmatmul.mubr.msk.f32.gmra.mxu1 %vm243_vm1, %v4351_v16  ;;  %3865 = vmatprep.mubr.msk.f32.mxu0 %vm243_vm1, %v4369_v22  ;;  %v2068_v16 = vld [vmem:[%s4293_s25 + $0xa] sm:$0xff] }
  0x5a   : > { %3815 = vmatprep.mubr.msk.f32.mxu1 %vm243_vm1, %v4355_v18  ;;  %v4795_v18 = vld [vmem:[%s4293_s25 + $0x22] sm:$0xff] }
  0x5c   : > { %3866 = vmatmul.mubr.msk.f32.gmra.mxu0 %vm243_vm1, %v4379_v24 }
  0x5d   : > { %3816 = vmatmul.mubr.msk.f32.gmra.mxu1 %vm243_vm1, %v4365_v20  ;;  %3868 = vmatprep.mubr.msk.f32.mxu0 %vm243_vm1, %v4383_v26  ;;  %v4813_v20 = vld [vmem:[%s4293_s25 + $0x3a] sm:$0xff] }
  0x5e   : > { %3818 = vmatprep.mubr.msk.f32.mxu1 %vm243_vm1, %v4369_v22  ;;  %v4827_v22 = vld [vmem:[%s4293_s25 + $0x52] sm:$0xff] }
  0x60   : > { %3869 = vmatmul.mubr.msk.f32.gmra.mxu0 %vm243_vm1, %v4393_v28 }
  0x61   : > { %3819 = vmatmul.mubr.msk.f32.gmra.mxu1 %vm243_vm1, %v4379_v24  ;;  %3871 = vmatprep.mubr.msk.f32.mxu0 %vm243_vm1, %v4397_v30  ;;  %v4841_v24 = vld [vmem:[%s4293_s25 + $0x6a] sm:$0xff] }
  0x62   : > { %3821 = vmatprep.mubr.msk.f32.mxu1 %vm243_vm1, %v4383_v26  ;;  %v4855_v26 = vld [vmem:[%s4293_s25 + $0x82] sm:$0xff] }
  0x64   : > { %3872 = vmatmul.mubr.msk.f32.gmra.mxu0 %vm243_vm1, %v4407_v32 }
  0x65   : > { %3822 = vmatmul.mubr.msk.f32.gmra.mxu1 %vm243_vm1, %v4393_v28  ;;  %3874 = vmatprep.mubr.msk.f32.mxu0 %vm243_vm1, %v4411_v34  ;;  %v4869_v28 = vld [vmem:[%s4293_s25 + $0x9a] sm:$0xff] }
  0x66   : > { %3824 = vmatprep.mubr.msk.f32.mxu1 %vm243_vm1, %v4397_v30  ;;  %v4883_v30 = vld [vmem:[%s4293_s25 + $0xb2] sm:$0xff] }
  0x68   : > { %3875 = vmatmul.mubr.msk.f32.gmra.mxu0 %vm243_vm1, %v4421_v36 }
  0x69   : > { %3825 = vmatmul.mubr.msk.f32.gmra.mxu1 %vm243_vm1, %v4407_v32  ;;  %3877 = vmatprep.mubr.msk.f32.mxu0 %vm243_vm1, %v238_v39  ;;  %v4897_v32 = vld [vmem:[%s4293_s25 + $0xca] sm:$0xff] }
  0x6a   : > { %3827 = vmatprep.mubr.msk.f32.mxu1 %vm243_vm1, %v4411_v34 }
  0x6c   : > { %3878 = vmatmul.mubr.msk.f32.gmra.mxu0 %vm243_vm1, %v239_v40 }
  0x6d   : > { %3828 = vmatmul.mubr.msk.f32.gmra.mxu1 %vm243_vm1, %v4421_v36  ;;  %3880 = vmatprep.mubr.msk.f32.mxu0 %vm243_vm1, %v240_v41  ;;  %v4915_v36 = vld [vmem:[%s4293_s25 + $0xe2] sm:$0xff] }
  0x6e   : > { %3830 = vmatprep.mubr.msk.f32.mxu1 %vm243_vm1, %v238_v39  ;;  %v4922_v39 = vld [vmem:[%s4293_s25 + $0xf2] sm:$0xff] }
  0x70   : > { %3881 = vmatmul.mubr.msk.f32.gmra.mxu0 %vm243_vm1, %v241_v42  ;;  %v4937_v42 = vld [vmem:[%s4293_s25 + $0xfa] sm:$0xff] }
  0x71   : > { %3831 = vmatmul.mubr.msk.f32.gmra.mxu1 %vm243_vm1, %v239_v40  ;;  %3935 = vmatprep.mubr.msk.f32.mxu0 %vm243_vm1, %v1139_v44 }
  0x72   : > { %3885 = vmatprep.mubr.msk.f32.mxu1 %vm243_vm1, %v1137_v43 }
  0x74   : > { %3936 = vmatmul.mubr.msk.f32.vlgmr.msra.gmra.mxu0 %vm243_vm1, %v1140_v46 }
  0x75   : > { %3886 = vmatmul.mubr.msk.f32.vlgmr.msra.gmra.mxu1 %vm243_vm1, %v1138_v45  ;;  %4034 = vmatpush3.msk.msra.mxu0 %vm340_vm0, %v4439_v38  ;;  %v4944_v45 = vld [vmem:[%s4293_s25 + $0x10a] sm:$0xff] }
  0x76   : > { %3984 = vmatpush3.msk.msra.mxu1 %vm340_vm0, %v4434_v37  ;;  %3888 = vmatprep.mubr.msk.f32.mxu1 %vm243_vm1, %v1139_v44 }
  0x77   : > { %3938 = vmatprep.mubr.msk.f32.mxu0 %vm243_vm1, %v4552_v47  ;;  %4083 = vmatprep.subr.msk.mxu1 %vm340_vm0, %v4559_v48 }
  0x78   : > { %4133 = vmatprep.subr.msk.mxu0 %vm340_vm0, %v4564_v49  ;;  %3939 = vmatmul.mubr.msk.f32.gmra.mxu0 %vm243_vm1, %v4571_v50 }
  0x79   : > { %3889 = vmatmul.mubr.msk.f32.gmra.mxu1 %vm243_vm1, %v1140_v46  ;;  %3941 = vmatprep.mubr.msk.f32.mxu0 %vm243_vm1, %v4577_v51 }
  0x7a   : > { %3891 = vmatprep.mubr.msk.f32.mxu1 %vm243_vm1, %v4552_v47 }
  0x7c   : > { %3942 = vmatmul.mubr.msk.f32.gmra.mxu0 %vm243_vm1, %v4591_v52 }
  0x7d   : > { %3892 = vmatmul.mubr.msk.f32.gmra.mxu1 %vm243_vm1, %v4571_v50  ;;  %3944 = vmatprep.mubr.msk.f32.mxu0 %vm243_vm1, %v4594_v53 }
  0x7e   : > { %3894 = vmatprep.mubr.msk.f32.mxu1 %vm243_vm1, %v4577_v51 }
  0x80   : > { %3945 = vmatmul.mubr.msk.f32.gmra.mxu0 %vm243_vm1, %v4605_v54 }
  0x81   : > { %3895 = vmatmul.mubr.msk.f32.gmra.mxu1 %vm243_vm1, %v4591_v52  ;;  %3947 = vmatprep.mubr.msk.f32.mxu0 %vm243_vm1, %v4608_v55 }
  0x82   : > { %3897 = vmatprep.mubr.msk.f32.mxu1 %vm243_vm1, %v4594_v53 }
  0x84   : > { %3948 = vmatmul.mubr.msk.f32.gmra.mxu0 %vm243_vm1, %v4619_v56 }
  0x85   : > { %3898 = vmatmul.mubr.msk.f32.gmra.mxu1 %vm243_vm1, %v4605_v54  ;;  %3950 = vmatprep.mubr.msk.f32.mxu0 %vm243_vm1, %v4622_v57 }
  0x86   : > { %3900 = vmatprep.mubr.msk.f32.mxu1 %vm243_vm1, %v4608_v55 }
  0x88   : > { %3951 = vmatmul.mubr.msk.f32.gmra.mxu0 %vm243_vm1, %v4633_v58 }
  0x89   : > { %3901 = vmatmul.mubr.msk.f32.gmra.mxu1 %vm243_vm1, %v4619_v56  ;;  %3953 = vmatprep.mubr.msk.f32.mxu0 %vm243_vm1, %v4636_v59 }
  0x8a   : > { %3903 = vmatprep.mubr.msk.f32.mxu1 %vm243_vm1, %v4622_v57 }
  0x8c   : > { %3954 = vmatmul.mubr.msk.f32.gmra.mxu0 %vm243_vm1, %v4647_v60 }
  0x8d   : > { %3904 = vmatmul.mubr.msk.f32.gmra.mxu1 %vm243_vm1, %v4633_v58  ;;  %3956 = vmatprep.mubr.msk.f32.mxu0 %vm243_vm1, %v4650_v61 }
  0x8e   : > { %3906 = vmatprep.mubr.msk.f32.mxu1 %vm243_vm1, %v4636_v59 }
  0x90   : > { %3957 = vmatmul.mubr.msk.f32.gmra.mxu0 %vm243_vm1, %v4661_v62 }
  0x91   : > { %3907 = vmatmul.mubr.msk.f32.gmra.mxu1 %vm243_vm1, %v4647_v60  ;;  %3959 = vmatprep.mubr.msk.f32.mxu0 %vm243_vm1, %v4664_v63 }
  0x92   : > { %3909 = vmatprep.mubr.msk.f32.mxu1 %vm243_vm1, %v4650_v61 }
  0x94   : > { %3960 = vmatmul.mubr.msk.f32.gmra.mxu0 %vm243_vm1, %v4675_v0 }
  0x95   : > { %3910 = vmatmul.mubr.msk.f32.gmra.mxu1 %vm243_vm1, %v4661_v62  ;;  %3962 = vmatprep.mubr.msk.f32.mxu0 %vm243_vm1, %v4678_v1 }
  0x96   : > { %3912 = vmatprep.mubr.msk.f32.mxu1 %vm243_vm1, %v4664_v63 }
  0x98   : > { %3963 = vmatmul.mubr.msk.f32.gmra.mxu0 %vm243_vm1, %v4689_v2 }
  0x99   : > { %3913 = vmatmul.mubr.msk.f32.gmra.mxu1 %vm243_vm1, %v4675_v0  ;;  %3965 = vmatprep.mubr.msk.f32.mxu0 %vm243_vm1, %v4692_v3 }
  0x9a   : > { %3915 = vmatprep.mubr.msk.f32.mxu1 %vm243_vm1, %v4678_v1 }
  0x9c   : > { %3966 = vmatmul.mubr.msk.f32.gmra.mxu0 %vm243_vm1, %v4703_v4 }
  0x9d   : > { %3916 = vmatmul.mubr.msk.f32.gmra.mxu1 %vm243_vm1, %v4689_v2  ;;  %3968 = vmatprep.mubr.msk.f32.mxu0 %vm243_vm1, %v4706_v5 }
  0x9e   : > { %3918 = vmatprep.mubr.msk.f32.mxu1 %vm243_vm1, %v4692_v3 }
  0xa0   : > { %3969 = vmatmul.mubr.msk.f32.gmra.mxu0 %vm243_vm1, %v4717_v6 }
  0xa1   : > { %3919 = vmatmul.mubr.msk.f32.gmra.mxu1 %vm243_vm1, %v4703_v4  ;;  %3971 = vmatprep.mubr.msk.f32.mxu0 %vm243_vm1, %v4720_v7 }
  0xa2   : > { %3921 = vmatprep.mubr.msk.f32.mxu1 %vm243_vm1, %v4706_v5 }
  0xa4   : > { %3972 = vmatmul.mubr.msk.f32.gmra.mxu0 %vm243_vm1, %v4731_v8 }
  0xa5   : > { %3922 = vmatmul.mubr.msk.f32.gmra.mxu1 %vm243_vm1, %v4717_v6  ;;  %3974 = vmatprep.mubr.msk.f32.mxu0 %vm243_vm1, %v4734_v9 }
  0xa6   : > { %3924 = vmatprep.mubr.msk.f32.mxu1 %vm243_vm1, %v4720_v7 }
  0xa8   : > { %3975 = vmatmul.mubr.msk.f32.gmra.mxu0 %vm243_vm1, %v4745_v10 }
  0xa9   : > { %3925 = vmatmul.mubr.msk.f32.gmra.mxu1 %vm243_vm1, %v4731_v8  ;;  %3977 = vmatprep.mubr.msk.f32.mxu0 %vm243_vm1, %v4748_v11 }
  0xaa   : > { %3927 = vmatprep.mubr.msk.f32.mxu1 %vm243_vm1, %v4734_v9 }
  0xac   : > { %3978 = vmatmul.mubr.msk.f32.gmra.mxu0 %vm243_vm1, %v4759_v12 }
  0xad   : > { %3928 = vmatmul.mubr.msk.f32.gmra.mxu1 %vm243_vm1, %v4745_v10  ;;  %3980 = vmatprep.mubr.msk.f32.mxu0 %vm243_vm1, %v4762_v13 }
  0xae   : > { %3930 = vmatprep.mubr.msk.f32.mxu1 %vm243_vm1, %v4748_v11 }
  0xb0   : > { %3981 = vmatmul.mubr.msk.f32.gmra.mxu0 %vm243_vm1, %v4773_v14 }
  0xb1   : > { %3931 = vmatmul.mubr.msk.f32.gmra.mxu1 %vm243_vm1, %v4759_v12  ;;  %4035 = vmatprep.mubr.msk.f32.mxu0 %vm243_vm1, %v2067_v15 }
  0xb2   : > { %3985 = vmatprep.mubr.msk.f32.mxu1 %vm243_vm1, %v4552_v47 }
  0xb4   : > { %4036 = vmatmul.mubr.msk.f32.vlgmr.msra.gmra.mxu0 %vm243_vm1, %v2068_v16 }
  0xb5   : > { %3986 = vmatmul.mubr.msk.f32.vlgmr.msra.gmra.mxu1 %vm243_vm1, %v4571_v50  ;;  %4134 = vmatpush3.msk.msra.mxu0 %vm340_vm0, %v4564_v49 }
  0xb6   : > { %4084 = vmatpush3.msk.msra.mxu1 %vm340_vm0, %v4559_v48  ;;  %3988 = vmatprep.mubr.msk.f32.mxu1 %vm243_vm1, %v4577_v51  ;;  %v4959_v48 = vld [vmem:[%s4293_s25 + $0x112] sm:$0xff]  ;;  %v4966_v51 = vld [vmem:[%s4293_s25 + $0x122] sm:$0xff] }
  0xb7   : > { %4038 = vmatprep.mubr.msk.f32.mxu0 %vm243_vm1, %v4785_v17 }
  0xb8   : > { %4039 = vmatmul.mubr.msk.f32.gmra.mxu0 %vm243_vm1, %v4795_v18 }
  0xb9   : > { %3989 = vmatmul.mubr.msk.f32.gmra.mxu1 %vm243_vm1, %v4591_v52  ;;  %4041 = vmatprep.mubr.msk.f32.mxu0 %vm243_vm1, %v4802_v19 }
  0xba   : > { %3991 = vmatprep.mubr.msk.f32.mxu1 %vm243_vm1, %v4594_v53 }
  0xbc   : > { %4042 = vmatmul.mubr.msk.f32.gmra.mxu0 %vm243_vm1, %v4813_v20 }
  0xbd   : > { %3992 = vmatmul.mubr.msk.f32.gmra.mxu1 %vm243_vm1, %v4605_v54  ;;  %4044 = vmatprep.mubr.msk.f32.mxu0 %vm243_vm1, %v4816_v21  ;;  %v4981_v54 = vld [vmem:[%s4293_s25 + $0x12a] sm:$0xff] }
  0xbe   : > { %3994 = vmatprep.mubr.msk.f32.mxu1 %vm243_vm1, %v4608_v55 }
  0xc0   : > { %4045 = vmatmul.mubr.msk.f32.gmra.mxu0 %vm243_vm1, %v4827_v22 }
  0xc1   : > { %3995 = vmatmul.mubr.msk.f32.gmra.mxu1 %vm243_vm1, %v4619_v56  ;;  %4047 = vmatprep.mubr.msk.f32.mxu0 %vm243_vm1, %v4830_v23 }
  0xc2   : > { %3997 = vmatprep.mubr.msk.f32.mxu1 %vm243_vm1, %v4622_v57  ;;  %v4988_v57 = vld [vmem:[%s4293_s25 + $0x13a] sm:$0xff] }
  0xc4   : > { %4048 = vmatmul.mubr.msk.f32.gmra.mxu0 %vm243_vm1, %v4841_v24 }
  0xc5   : > { %3998 = vmatmul.mubr.msk.f32.gmra.mxu1 %vm243_vm1, %v4633_v58  ;;  %4050 = vmatprep.mubr.msk.f32.mxu0 %vm243_vm1, %v4844_v25 }
  0xc6   : > { %4000 = vmatprep.mubr.msk.f32.mxu1 %vm243_vm1, %v4636_v59 }
  0xc8   : > { %4051 = vmatmul.mubr.msk.f32.gmra.mxu0 %vm243_vm1, %v4855_v26 }
  0xc9   : > { %4001 = vmatmul.mubr.msk.f32.gmra.mxu1 %vm243_vm1, %v4647_v60  ;;  %4053 = vmatprep.mubr.msk.f32.mxu0 %vm243_vm1, %v4858_v27  ;;  %v5003_v60 = vld [vmem:[%s4293_s25 + $0x142] sm:$0xff] }
  0xca   : > { %4003 = vmatprep.mubr.msk.f32.mxu1 %vm243_vm1, %v4650_v61 }
  0xcc   : > { %4054 = vmatmul.mubr.msk.f32.gmra.mxu0 %vm243_vm1, %v4869_v28 }
  0xcd   : > { %4004 = vmatmul.mubr.msk.f32.gmra.mxu1 %vm243_vm1, %v4661_v62  ;;  %4056 = vmatprep.mubr.msk.f32.mxu0 %vm243_vm1, %v4872_v29 }
  0xce   : > { %4006 = vmatprep.mubr.msk.f32.mxu1 %vm243_vm1, %v4664_v63  ;;  %v5010_v63 = vld [vmem:[%s4293_s25 + $0x152] sm:$0xff] }
  0xd0   : > { %4057 = vmatmul.mubr.msk.f32.gmra.mxu0 %vm243_vm1, %v4883_v30 }
  0xd1   : > { %4007 = vmatmul.mubr.msk.f32.gmra.mxu1 %vm243_vm1, %v4675_v0  ;;  %4059 = vmatprep.mubr.msk.f32.mxu0 %vm243_vm1, %v4886_v31 }
  0xd2   : > { %4009 = vmatprep.mubr.msk.f32.mxu1 %vm243_vm1, %v4678_v1 }
  0xd4   : > { %v4902_v34 = vpop.f32.mrf.mxu0  ;;  %4060 = vmatmul.mubr.msk.f32.gmra.mxu0 %vm243_vm1, %v4897_v32 }
  0xd5   : > { %v4904_v35 = vpop.f32.mrf.mxu1  ;;  %4010 = vmatmul.mubr.msk.f32.gmra.mxu1 %vm243_vm1, %v4689_v2  ;;  %4062 = vmatprep.mubr.msk.f32.mxu0 %vm243_vm1, %v4900_v33  ;;  %v5025_v2 = vld [vmem:[%s4293_s25 + $0x15a] sm:$0xff] }
  0xd6   : > { %4012 = vmatprep.mubr.msk.f32.mxu1 %vm243_vm1, %v4692_v3  ;;  %v4917_v37 = vpop.f32.mrf.mxu0 }
  0xd7   : > { %v4919_v38 = vpop.f32.mrf.mxu1 }
  0xd8   : > { %v4924_v40 = vpop.f32.mrf.mxu0  ;;  %4063 = vmatmul.mubr.msk.f32.gmra.mxu0 %vm243_vm1, %v4915_v36 }
  0xd9   : > { %v4926_v41 = vpop.f32.mrf.mxu1  ;;  %4013 = vmatmul.mubr.msk.f32.gmra.mxu1 %vm243_vm1, %v4703_v4  ;;  %4065 = vmatprep.mubr.msk.f32.mxu0 %vm243_vm1, %v4922_v39 }
  0xda   : > { %4015 = vmatprep.mubr.msk.f32.mxu1 %vm243_vm1, %v4706_v5  ;;  %v4939_v43 = vpop.f32.mrf.mxu0  ;;  %v1171_v5 = vld [vmem:[%s4293_s25 + $0x199] sm:$0xff] }
  0xdb   : > { %v4941_v44 = vpop.f32.mrf.mxu1 }
  0xdc   : > { %v4946_v46 = vpop.f32.mrf.mxu0  ;;  %4066 = vmatmul.mubr.msk.f32.gmra.mxu0 %vm243_vm1, %v4937_v42 }
  0xdd   : > { %v4948_v47 = vpop.f32.mrf.mxu1  ;;  %4016 = vmatmul.mubr.msk.f32.gmra.mxu1 %vm243_vm1, %v4717_v6  ;;  %4068 = vmatprep.mubr.msk.f32.mxu0 %vm243_vm1, %v4944_v45  ;;  %v5033_v6 = vld [vmem:[%s4293_s25 + $0x16a] sm:$0xff] }
  0xde   : > { %4018 = vmatprep.mubr.msk.f32.mxu1 %vm243_vm1, %v4720_v7  ;;  %v4961_v49 = vpop.f32.mrf.mxu0  ;;  %5727 = vst [vmem:[#allocation4_spill] sm:$0xff] %v5033_v6 }
  0xdf   : > { %v4963_v50 = vpop.f32.mrf.mxu1 }
  0xe0   : > { %v4968_v52 = vpop.f32.mrf.mxu0  ;;  %4069 = vmatmul.mubr.msk.f32.gmra.mxu0 %vm243_vm1, %v4959_v48 }
  0xe1   : > { %v4970_v53 = vpop.f32.mrf.mxu1  ;;  %4019 = vmatmul.mubr.msk.f32.gmra.mxu1 %vm243_vm1, %v4731_v8  ;;  %4071 = vmatprep.mubr.msk.f32.mxu0 %vm243_vm1, %v4966_v51 }
  0xe2   : > { %4021 = vmatprep.mubr.msk.f32.mxu1 %vm243_vm1, %v4734_v9  ;;  %v4983_v55 = vpop.f32.mrf.mxu0  ;;  %v1172_v9 = vld [vmem:[%s4293_s25 + $0x1a1] sm:$0xff] }
  0xe3   : > { %v4985_v56 = vpop.f32.mrf.mxu1 }
  0xe4   : > { %v4990_v58 = vpop.f32.mrf.mxu0  ;;  %4072 = vmatmul.mubr.msk.f32.gmra.mxu0 %vm243_vm1, %v4981_v54 }
  0xe5   : > { %v4992_v59 = vpop.f32.mrf.mxu1  ;;  %4022 = vmatmul.mubr.msk.f32.gmra.mxu1 %vm243_vm1, %v4745_v10  ;;  %4074 = vmatprep.mubr.msk.f32.mxu0 %vm243_vm1, %v4988_v57  ;;  %v5048_v10 = vld [vmem:[%s4293_s25 + $0x172] sm:$0xff] }
  0xe6   : > { %4024 = vmatprep.mubr.msk.f32.mxu1 %vm243_vm1, %v4748_v11  ;;  %v5005_v61 = vpop.f32.mrf.mxu0  ;;  %5729 = vst [vmem:[#allocation6_spill] sm:$0xff] %v5048_v10 }
  0xe7   : > { %v5007_v62 = vpop.f32.mrf.mxu1 }
  0xe8   : > { %v5012_v0 = vpop.f32.mrf.mxu0  ;;  %4075 = vmatmul.mubr.msk.f32.gmra.mxu0 %vm243_vm1, %v5003_v60 }
  0xe9   : > { %v5014_v1 = vpop.f32.mrf.mxu1  ;;  %4025 = vmatmul.mubr.msk.f32.gmra.mxu1 %vm243_vm1, %v4759_v12  ;;  %4077 = vmatprep.mubr.msk.f32.mxu0 %vm243_vm1, %v5010_v63 }
  0xea   : > { %5725 = vst [vmem:[#allocation2_spill] sm:$0xff] %v5014_v1  ;;  %4027 = vmatprep.mubr.msk.f32.mxu1 %vm243_vm1, %v4762_v13  ;;  %v5027_v3 = vpop.f32.mrf.mxu0 }
  0xeb   : > { %v5029_v4 = vpop.f32.mrf.mxu1 }
  0xec   : > { %5726 = vst [vmem:[#allocation3_spill] sm:$0xff] %v5029_v4  ;;  %v5035_v7 = vpop.f32.mrf.mxu0  ;;  %4078 = vmatmul.mubr.msk.f32.gmra.mxu0 %vm243_vm1, %v5025_v2 }
  0xed   : > { %v5037_v8 = vpop.f32.mrf.mxu1  ;;  %4028 = vmatmul.mubr.msk.f32.gmra.mxu1 %vm243_vm1, %v4773_v14  ;;  %4080 = vmatprep.mubr.msk.f32.mxu0 %vm243_vm1, %v5033_v6  ;;  %v5068_v14 = vld [vmem:[%s5719_s2] ss:$0 sm:$0xff] }
  0xee   : > { %5728 = vst [vmem:[#allocation5_spill] sm:$0xff] %v5037_v8  ;;  %4030 = vmatprep.mubr.msk.f32.mxu1 %vm243_vm1, %v1171_v5  ;;  %v5050_v11 = vpop.f32.mrf.mxu0  ;;  %v572_v4 = vadd.f32 %v4924_v40, %v5068_v14 }
  0xef   : > { %v5052_v12 = vpop.f32.mrf.mxu1 }
  0xf0   : > { %5730 = vst [vmem:[#allocation7_spill] sm:$0xff] %v5052_v12  ;;  %v5054_v13 = vpop.f32.mrf.mxu0  ;;  %4081 = vmatmul.mubr.msk.f32.gmra.mxu0 %vm243_vm1, %v5048_v10 }
  0xf1   : > { %v5056_v15 = vpop.f32.mrf.mxu1  ;;  %4031 = vmatmul.mubr.msk.f32.gmra.mxu1 %vm243_vm1, %v1172_v9  ;;  %4135 = vmatprep.mubr.msk.f32.mxu0 %vm243_vm1, %v4802_v19  ;;  %v570_v9 = vadd.f32 %v4902_v34, %v5068_v14 }
  0xf2   : > { %5731 = vst [vmem:[#allocation8_spill] sm:$0xff] %v5056_v15  ;;  %4085 = vmatprep.mubr.msk.f32.mxu1 %vm243_vm1, %v4785_v17  ;;  %v5070_v16 = vpop.f32.mrf.mxu0  ;;  %v569_v17 = vadd.f32 %v5068_v14, %v4917_v37 }
  0xf3   : > { %v5072_v5 = vpop.f32.mrf.mxu1 }
  0xf4   : > { %5732 = vst [vmem:[#allocation9_spill] sm:$0xff] %v5072_v5  ;;  %v3837_v12 = vpop.f32.mrf.mxu0  ;;  %4136 = vmatmul.mubr.msk.f32.vlgmr.msra.gmra.mxu0 %vm243_vm1, %v4813_v20 }
  0xf5   : > { %v3787_v15 = vpop.f32.mrf.mxu1  ;;  %4086 = vmatmul.mubr.msk.f32.vlgmr.msra.gmra.mxu1 %vm243_vm1, %v4795_v18  ;;  %4138 = vmatprep.mubr.msk.f32.mxu0 %vm243_vm1, %v4816_v21 }
  0xf6   : > { %v838_v8 = vadd.f32 %v3787_v15, %v570_v9  ;;  %4088 = vmatprep.mubr.msk.f32.mxu1 %vm243_vm1, %v4802_v19  ;;  %v946_v34 = vpop.f32.mrf.mxu0  ;;  %v571_v19 = vadd.f32 %v5068_v14, %v4939_v43 }
  0xf7   : > { %v678_v5 = vpop.f32.mrf.mxu1 }
  0xf8   : > { %v5088_v10 = vadd.f32 %v3837_v12, %v838_v8  ;;  %v837_v18 = vadd.f32 %v678_v5, %v569_v17  ;;  %v3840_v6 = vpop.f32.mrf.mxu0  ;;  %4139 = vmatmul.mubr.msk.f32.gmra.mxu0 %vm243_vm1, %v4827_v22 }
  0xf9   : > { %v3790_v1 = vpop.f32.mrf.mxu1  ;;  %4089 = vmatmul.mubr.msk.f32.gmra.mxu1 %vm243_vm1, %v4813_v20  ;;  %4141 = vmatprep.mubr.msk.f32.mxu0 %vm243_vm1, %v4830_v23  ;;  %v574_v20 = vadd.f32 %v4946_v46, %v5068_v14 }
  0xfa   : > { %v5096_v37 = vadd.f32 %v946_v34, %v837_v18  ;;  %v840_v15 = vadd.f32 %v3790_v1, %v572_v4  ;;  %4091 = vmatprep.mubr.msk.f32.mxu1 %vm243_vm1, %v4816_v21  ;;  %v956_v8 = vpop.f32.mrf.mxu0  ;;  %v573_v21 = vadd.f32 %v5068_v14, %v4961_v49 }
  0xfb   : > { %v688_v40 = vpop.f32.mrf.mxu1 }
  0xfc   : > { %v5104_v12 = vadd.f32 %v3840_v6, %v840_v15  ;;  %v839_v5 = vadd.f32 %v688_v40, %v571_v19  ;;  %v3843_v17 = vpop.f32.mrf.mxu0  ;;  %4142 = vmatmul.mubr.msk.f32.gmra.mxu0 %vm243_vm1, %v4841_v24 }
  0xfd   : > { %v3793_v9 = vpop.f32.mrf.mxu1  ;;  %4092 = vmatmul.mubr.msk.f32.gmra.mxu1 %vm243_vm1, %v4827_v22  ;;  %4144 = vmatprep.mubr.msk.f32.mxu0 %vm243_vm1, %v4844_v25  ;;  %v576_v22 = vadd.f32 %v4968_v52, %v5068_v14 }
  0xfe   : > { %v5112_v43 = vadd.f32 %v956_v8, %v839_v5  ;;  %v842_v1 = vadd.f32 %v3793_v9, %v574_v20  ;;  %4094 = vmatprep.mubr.msk.f32.mxu1 %vm243_vm1, %v4830_v23  ;;  %v966_v4 = vpop.f32.mrf.mxu0  ;;  %v575_v23 = vadd.f32 %v5068_v14, %v4983_v55 }
  0xff   : > { %v698_v46 = vpop.f32.mrf.mxu1 }
 0x100   : > { %v5120_v6 = vadd.f32 %v3843_v17, %v842_v1  ;;  %v841_v34 = vadd.f32 %v698_v46, %v573_v21  ;;  %v3846_v19 = vpop.f32.mrf.mxu0  ;;  %4145 = vmatmul.mubr.msk.f32.gmra.mxu0 %vm243_vm1, %v4855_v26 }
 0x101   : > { %v3796_v18 = vpop.f32.mrf.mxu1  ;;  %4095 = vmatmul.mubr.msk.f32.gmra.mxu1 %vm243_vm1, %v4841_v24  ;;  %4147 = vmatprep.mubr.msk.f32.mxu0 %vm243_vm1, %v4858_v27  ;;  %v578_v24 = vadd.f32 %v4990_v58, %v5068_v14 }
 0x102   : > { %v5128_v49 = vadd.f32 %v966_v4, %v841_v34  ;;  %v844_v15 = vadd.f32 %v3796_v18, %v576_v22  ;;  %4097 = vmatprep.mubr.msk.f32.mxu1 %vm243_vm1, %v4844_v25  ;;  %v976_v40 = vpop.f32.mrf.mxu0  ;;  %v577_v25 = vadd.f32 %v5068_v14, %v5005_v61 }
 0x103   : > { %v708_v52 = vpop.f32.mrf.mxu1 }
 0x104   : > { %v5136_v8 = vadd.f32 %v3846_v19, %v844_v15  ;;  %v843_v20 = vadd.f32 %v708_v52, %v575_v23  ;;  %v3849_v9 = vpop.f32.mrf.mxu0  ;;  %4148 = vmatmul.mubr.msk.f32.gmra.mxu0 %vm243_vm1, %v4869_v28 }
 0x105   : > { %v3799_v5 = vpop.f32.mrf.mxu1  ;;  %4098 = vmatmul.mubr.msk.f32.gmra.mxu1 %vm243_vm1, %v4855_v26  ;;  %4150 = vmatprep.mubr.msk.f32.mxu0 %vm243_vm1, %v4872_v29  ;;  %v580_v26 = vadd.f32 %v5012_v0, %v5068_v14 }
 0x106   : > { %v5144_v55 = vadd.f32 %v976_v40, %v843_v20  ;;  %v846_v17 = vadd.f32 %v3799_v5, %v578_v24  ;;  %4100 = vmatprep.mubr.msk.f32.mxu1 %vm243_vm1, %v4858_v27  ;;  %v986_v21 = vpop.f32.mrf.mxu0  ;;  %v579_v27 = vadd.f32 %v5068_v14, %v5027_v3 }
 0x107   : > { %v718_v58 = vpop.f32.mrf.mxu1 }
 0x108   : > { %v5152_v1 = vadd.f32 %v3849_v9, %v846_v17  ;;  %v845_v46 = vadd.f32 %v718_v58, %v577_v25  ;;  %v3852_v22 = vpop.f32.mrf.mxu0  ;;  %4151 = vmatmul.mubr.msk.f32.gmra.mxu0 %vm243_vm1, %v4883_v30 }
 0x109   : > { %v3802_v4 = vpop.f32.mrf.mxu1  ;;  %4101 = vmatmul.mubr.msk.f32.gmra.mxu1 %vm243_vm1, %v4869_v28  ;;  %4153 = vmatprep.mubr.msk.f32.mxu0 %vm243_vm1, %v4886_v31  ;;  %v582_v28 = vadd.f32 %v5035_v7, %v5068_v14 }
 0x10a   : > { %v5160_v61 = vadd.f32 %v986_v21, %v845_v46  ;;  %v848_v34 = vadd.f32 %v3802_v4, %v580_v26  ;;  %4103 = vmatprep.mubr.msk.f32.mxu1 %vm243_vm1, %v4872_v29  ;;  %v996_v18 = vpop.f32.mrf.mxu0  ;;  %v581_v29 = vadd.f32 %v5068_v14, %v5050_v11 }
 0x10b   : > { %v728_v0 = vpop.f32.mrf.mxu1 }
 0x10c   : > { %v5168_v19 = vadd.f32 %v3852_v22, %v848_v34  ;;  %v847_v23 = vadd.f32 %v728_v0, %v579_v27  ;;  %v3855_v52 = vpop.f32.mrf.mxu0  ;;  %4154 = vmatmul.mubr.msk.f32.gmra.mxu0 %vm243_vm1, %v4897_v32 }
 0x10d   : > { %v3805_v15 = vpop.f32.mrf.mxu1  ;;  %4104 = vmatmul.mubr.msk.f32.gmra.mxu1 %vm243_vm1, %v4883_v30  ;;  %4156 = vmatprep.mubr.msk.f32.mxu0 %vm243_vm1, %v4900_v33  ;;  %v584_v30 = vadd.f32 %v5054_v13, %v5068_v14 }
 0x10e   : > { %v5176_v3 = vadd.f32 %v996_v18, %v847_v23  ;;  %v850_v40 = vadd.f32 %v3805_v15, %v582_v28  ;;  %4106 = vmatprep.mubr.msk.f32.mxu1 %vm243_vm1, %v4886_v31  ;;  %v1006_v24 = vpop.f32.mrf.mxu0  ;;  %v583_v31 = vadd.f32 %v5068_v14, %v5070_v16 }
 0x10f   : > { %v738_v7 = vpop.f32.mrf.mxu1 }
 0x110   : > { %v5184_v20 = vadd.f32 %v3855_v52, %v850_v40  ;;  %v849_v5 = vadd.f32 %v738_v7, %v581_v29  ;;  %v3858_v25 = vpop.f32.mrf.mxu0  ;;  %4157 = vmatmul.mubr.msk.f32.gmra.mxu0 %vm243_vm1, %v4915_v36 }
 0x111   : > { %v3808_v9 = vpop.f32.mrf.mxu1  ;;  %4107 = vmatmul.mubr.msk.f32.gmra.mxu1 %vm243_vm1, %v4897_v32  ;;  %4159 = vmatprep.mubr.msk.f32.mxu0 %vm243_vm1, %v4922_v39  ;;  %v586_v32 = vadd.f32 %v4904_v35, %v5068_v14 }
 0x112   : > { %v5192_v11 = vadd.f32 %v1006_v24, %v849_v5  ;;  %v852_v17 = vadd.f32 %v3808_v9, %v584_v30  ;;  %4109 = vmatprep.mubr.msk.f32.mxu1 %vm243_vm1, %v4900_v33  ;;  %v1016_v58 = vpop.f32.mrf.mxu0  ;;  %v585_v33 = vadd.f32 %v5068_v14, %v4919_v38  ;;  %v587_v38 = vadd.f32 %v5068_v14, %v4941_v44 }
 0x113   : > { %v748_v13 = vpop.f32.mrf.mxu1  ;;  %v589_v44 = vadd.f32 %v5068_v14, %v4963_v50  ;;  %v591_v50 = vadd.f32 %v5068_v14, %v4985_v56 }
 0x114   : > { %v5200_v21 = vadd.f32 %v3858_v25, %v852_v17  ;;  %v851_v26 = vadd.f32 %v748_v13, %v583_v31  ;;  %v3861_v4 = vpop.f32.mrf.mxu0  ;;  %4160 = vmatmul.mubr.msk.f32.gmra.mxu0 %vm243_vm1, %v4937_v42 }
 0x115   : > { %v3811_v46 = vpop.f32.mrf.mxu1  ;;  %4110 = vmatmul.mubr.msk.f32.gmra.mxu1 %vm243_vm1, %v4915_v36  ;;  %4162 = vmatprep.mubr.msk.f32.mxu0 %vm243_vm1, %v4944_v45  ;;  %v588_v36 = vadd.f32 %v4926_v41, %v5068_v14 }
 0x116   : > { %v5208_v16 = vadd.f32 %v1016_v58, %v851_v26  ;;  %v854_v22 = vadd.f32 %v3811_v46, %v586_v32  ;;  %4112 = vmatprep.mubr.msk.f32.mxu1 %vm243_vm1, %v4922_v39  ;;  %v1026_v27 = vpop.f32.mrf.mxu0 }
 0x117   : > { %v758_v35 = vpop.f32.mrf.mxu1 }
 0x118   : > { %v5216_v34 = vadd.f32 %v3861_v4, %v854_v22  ;;  %v853_v0 = vadd.f32 %v758_v35, %v585_v33  ;;  %v3864_v28 = vpop.f32.mrf.mxu0  ;;  %4163 = vmatmul.mubr.msk.f32.gmra.mxu0 %vm243_vm1, %v4959_v48  ;;  %v2099_v35 = vld [vmem:[%s4293_s25 + $0x182] sm:$0xff] }
 0x119   : > { %v3814_v18 = vpop.f32.mrf.mxu1  ;;  %4113 = vmatmul.mubr.msk.f32.gmra.mxu1 %vm243_vm1, %v4937_v42  ;;  %4165 = vmatprep.mubr.msk.f32.mxu0 %vm243_vm1, %v4966_v51  ;;  %v590_v42 = vadd.f32 %v4948_v47, %v5068_v14 }
 0x11a   : > { %v5224_v39 = vadd.f32 %v1026_v27, %v853_v0  ;;  %v856_v23 = vadd.f32 %v3814_v18, %v588_v36  ;;  %4115 = vmatprep.mubr.msk.f32.mxu1 %vm243_vm1, %v4944_v45  ;;  %v1036_v15 = vpop.f32.mrf.mxu0 }
 0x11b   : > { %v768_v41 = vpop.f32.mrf.mxu1 }
 0x11c   : > { %v5232_v52 = vadd.f32 %v3864_v28, %v856_v23  ;;  %v855_v29 = vadd.f32 %v768_v41, %v587_v38  ;;  %v3867_v7 = vpop.f32.mrf.mxu0  ;;  %4166 = vmatmul.mubr.msk.f32.gmra.mxu0 %vm243_vm1, %v4981_v54  ;;  %v5736_v28 = vld [vmem:[#allocation3_spill] sm:$0xff] }
 0x11d   : > { %v3817_v40 = vpop.f32.mrf.mxu1  ;;  %4116 = vmatmul.mubr.msk.f32.gmra.mxu1 %vm243_vm1, %v4959_v48  ;;  %4168 = vmatprep.mubr.msk.f32.mxu0 %vm243_vm1, %v4988_v57  ;;  %v592_v48 = vadd.f32 %v4970_v53, %v5068_v14  ;;  %v595_v38 = vadd.f32 %v5068_v14, %v5736_v28 }
 0x11e   : > { %v5240_v45 = vadd.f32 %v1036_v15, %v855_v29  ;;  %v858_v24 = vadd.f32 %v3817_v40, %v590_v42  ;;  %4118 = vmatprep.mubr.msk.f32.mxu1 %vm243_vm1, %v4966_v51  ;;  %v1046_v30 = vpop.f32.mrf.mxu0  ;;  %v2100_v15 = vld [vmem:[%s4293_s25 + $0x18a] sm:$0xff]  ;;  %v2101_v40 = vld [vmem:[%s4293_s25 + $0x19a] sm:$0xff] }
 0x11f   : > { %v778_v47 = vpop.f32.mrf.mxu1 }
 0x120   : > { %v5248_v5 = vadd.f32 %v3867_v7, %v858_v24  ;;  %v857_v9 = vadd.f32 %v778_v47, %v589_v44  ;;  %v3870_v31 = vpop.f32.mrf.mxu0  ;;  %4169 = vmatmul.mubr.msk.f32.gmra.mxu0 %vm243_vm1, %v5003_v60 }
 0x121   : > { %v3820_v25 = vpop.f32.mrf.mxu1  ;;  %4119 = vmatmul.mubr.msk.f32.gmra.mxu1 %vm243_vm1, %v4981_v54  ;;  %4171 = vmatprep.mubr.msk.f32.mxu0 %vm243_vm1, %v5010_v63  ;;  %v594_v54 = vadd.f32 %v4992_v59, %v5068_v14  ;;  %v5733_v59 = vld [vmem:[#allocation4_spill] sm:$0xff] }
 0x122   : > { %v5256_v51 = vadd.f32 %v1046_v30, %v857_v9  ;;  %v860_v17 = vadd.f32 %v3820_v25, %v592_v48  ;;  %4121 = vmatprep.mubr.msk.f32.mxu1 %vm243_vm1, %v4988_v57  ;;  %v1056_v13 = vpop.f32.mrf.mxu0  ;;  %v593_v57 = vadd.f32 %v5068_v14, %v5007_v62  ;;  %v5738_v48 = vld [vmem:[#allocation7_spill] sm:$0xff] }
 0x123   : > { %v788_v53 = vpop.f32.mrf.mxu1  ;;  %v597_v9 = vadd.f32 %v5068_v14, %v5738_v48 }
 0x124   : > { %v5264_v58 = vadd.f32 %v3870_v31, %v860_v17  ;;  %v859_v32 = vadd.f32 %v788_v53, %v591_v50  ;;  %v3873_v56 = vpop.f32.mrf.mxu0  ;;  %4172 = vmatmul.mubr.msk.f32.gmra.mxu0 %vm243_vm1, %v5025_v2  ;;  %v2102_v50 = vld [vmem:[%s4293_s25 + $0x1a2] sm:$0xff] }
 0x125   : > { %v3823_v26 = vpop.f32.mrf.mxu1  ;;  %4122 = vmatmul.mubr.msk.f32.gmra.mxu1 %vm243_vm1, %v5003_v60  ;;  %4174 = vmatprep.mubr.msk.f32.mxu0 %vm243_vm1, %v5733_v59  ;;  %v5734_v60 = vld [vmem:[#allocation2_spill] sm:$0xff] }
 0x126   : > { %v5272_v46 = vadd.f32 %v1056_v13, %v859_v32  ;;  %v862_v4 = vadd.f32 %v3823_v26, %v594_v54  ;;  %4124 = vmatprep.mubr.msk.f32.mxu1 %vm243_vm1, %v5010_v63  ;;  %v1066_v22 = vpop.f32.mrf.mxu0  ;;  %v596_v27 = vadd.f32 %v5734_v60, %v5068_v14  ;;  %v5735_v63 = vld [vmem:[#allocation6_spill] sm:$0xff]  ;;  %v5739_v13 = vld [vmem:[#allocation8_spill] sm:$0xff] }
 0x127   : > { %v798_v33 = vpop.f32.mrf.mxu1  ;;  %v600_v54 = vadd.f32 %v5739_v13, %v5068_v14 }
 0x128   : > { %v5281_v36 = vadd.f32 %v3873_v56, %v862_v4  ;;  %v861_v62 = vadd.f32 %v798_v33, %v593_v57  ;;  %v3876_v18 = vpop.f32.mrf.mxu0  ;;  %4175 = vmatmul.mubr.msk.f32.gmra.mxu0 %vm243_vm1, %v5735_v63  ;;  %v5740_v4 = vld [vmem:[#allocation9_spill] sm:$0xff] }
 0x129   : > { %v3826_v0 = vpop.f32.mrf.mxu1  ;;  %4125 = vmatmul.mubr.msk.f32.gmra.mxu1 %vm243_vm1, %v5025_v2  ;;  %4177 = vmatprep.mubr.msk.f32.mxu0 %vm243_vm1, %v2099_v35  ;;  %v5737_v2 = vld [vmem:[#allocation5_spill] sm:$0xff] }
 0x12a   : > { %v5289_v23 = vadd.f32 %v1066_v22, %v861_v62  ;;  %v864_v41 = vadd.f32 %v3826_v0, %v596_v27  ;;  %4127 = vmatprep.mubr.msk.f32.mxu1 %vm243_vm1, %v5733_v59  ;;  %v1076_v29 = vpop.f32.mrf.mxu0  ;;  %v598_v7 = vadd.f32 %v5737_v2, %v5068_v14  ;;  %v599_v59 = vadd.f32 %v5068_v14, %v5740_v4 }
 0x12b   : > { %v808_v42 = vpop.f32.mrf.mxu1 }
 0x12c   : > { %v5298_v44 = vadd.f32 %v3876_v18, %v864_v41  ;;  %v863_v24 = vadd.f32 %v808_v42, %v595_v38  ;;  %v3879_v30 = vpop.f32.mrf.mxu0  ;;  %4178 = vmatmul.mubr.msk.f32.gmra.mxu0 %vm243_vm1, %v2100_v15 }
 0x12d   : > { %v3829_v47 = vpop.f32.mrf.mxu1  ;;  %4128 = vmatmul.mubr.msk.f32.gmra.mxu1 %vm243_vm1, %v5735_v63  ;;  %4180 = vmatprep.mubr.msk.f32.mxu0 %vm243_vm1, %v2101_v40 }
 0x12e   : > { %v5305_v25 = vadd.f32 %v1076_v29, %v863_v24  ;;  %v866_v31 = vadd.f32 %v3829_v47, %v598_v7  ;;  %4130 = vmatprep.mubr.msk.f32.mxu1 %vm243_vm1, %v2099_v35  ;;  %v1086_v53 = vpop.f32.mrf.mxu0 }
 0x12f   : > { %v818_v17 = vpop.f32.mrf.mxu1 }
 0x130   : > { %v5312_v32 = vadd.f32 %v3879_v30, %v866_v31  ;;  %v865_v26 = vadd.f32 %v818_v17, %v597_v9  ;;  %v3882_v57 = vpop.f32.mrf.mxu0  ;;  %4181 = vmatmul.mubr.msk.f32.gmra.mxu0 %vm243_vm1, %v2102_v50 }
 0x131   : > { %v3832_v56 = vpop.f32.mrf.mxu1  ;;  %4131 = vmatmul.mubr.msk.f32.gmra.mxu1 %vm243_vm1, %v2100_v15 }
 0x132   : > { %v5318_v33 = vadd.f32 %v1086_v53, %v865_v26  ;;  %v868_v22 = vadd.f32 %v3832_v56, %v600_v54  ;;  %v1096_v60 = vpop.f32.mrf.mxu0 }
 0x133   : > { %v828_v35 = vpop.f32.mrf.mxu1 }
 0x134   : > { %v5320_v27 = vadd.f32 %v3882_v57, %v868_v22  ;;  %v867_v62 = vadd.f32 %v828_v35, %v599_v59  ;;  %v3937_v18 = vpop.f32.mrf.mxu0 }
 0x135   : > { %v3887_v0 = vpop.f32.mrf.mxu1 }
 0x136   : > { %v5322_v63 = vadd.f32 %v1096_v60, %v867_v62  ;;  %v1500_v28 = vadd.f32 %v3887_v0, %v5088_v10  ;;  %v1608_v41 = vpop.f32.mrf.mxu0 }
 0x137   : > { %v1340_v38 = vpop.f32.mrf.mxu1 }
 0x138   : > { %v5325_v15 = vadd.f32 %v3937_v18, %v1500_v28  ;;  %v1499_v14 = vadd.f32 %v1340_v38, %v5096_v37  ;;  %v3940_v29 = vpop.f32.mrf.mxu0 }
 0x139   : > { %v3890_v42 = vpop.f32.mrf.mxu1 }
 0x13a   : > { %v5328_v40 = vadd.f32 %v1608_v41, %v1499_v14  ;;  %v1502_v2 = vadd.f32 %v3890_v42, %v5104_v12  ;;  %v1618_v24 = vpop.f32.mrf.mxu0 }
 0x13b   : > { %v1350_v7 = vpop.f32.mrf.mxu1 }
 0x13c   : > { %v5331_v47 = vadd.f32 %v3940_v29, %v1502_v2  ;;  %v1501_v30 = vadd.f32 %v1350_v7, %v5112_v43  ;;  %v3943_v10 = vpop.f32.mrf.mxu0 }
 0x13d   : > { %v3893_v48 = vpop.f32.mrf.mxu1 }
 0x13e   : > { %v5334_v9 = vadd.f32 %v1618_v24, %v1501_v30  ;;  %v1504_v31 = vadd.f32 %v3893_v48, %v5120_v6  ;;  %v1628_v37 = vpop.f32.mrf.mxu0 }
 0x13f   : > { %v1360_v50 = vpop.f32.mrf.mxu1 }
 0x140   : > { %v5337_v17 = vadd.f32 %v3943_v10, %v1504_v31  ;;  %v1503_v53 = vadd.f32 %v1360_v50, %v5128_v49  ;;  %v3946_v12 = vpop.f32.mrf.mxu0 }
 0x141   : > { %v3896_v13 = vpop.f32.mrf.mxu1 }
 0x142   : > { %v5340_v54 = vadd.f32 %v1628_v37, %v1503_v53  ;;  %v1506_v26 = vadd.f32 %v3896_v13, %v5136_v8  ;;  %v1638_v43 = vpop.f32.mrf.mxu0 }
 0x143   : > { %v1370_v56 = vpop.f32.mrf.mxu1 }
 0x144   : > { %v5343_v57 = vadd.f32 %v3946_v12, %v1506_v26  ;;  %v1505_v4 = vadd.f32 %v1370_v56, %v5144_v55  ;;  %v3949_v6 = vpop.f32.mrf.mxu0 }
 0x145   : > { %v3899_v59 = vpop.f32.mrf.mxu1 }
 0x146   : > { %v5346_v22 = vadd.f32 %v1638_v43, %v1505_v4  ;;  %v1508_v35 = vadd.f32 %v3899_v59, %v5152_v1  ;;  %v1648_v49 = vpop.f32.mrf.mxu0 }
 0x147   : > { %v1380_v60 = vpop.f32.mrf.mxu1 }
 0x148   : > { %v5349_v62 = vadd.f32 %v3949_v6, %v1508_v35  ;;  %v1507_v0 = vadd.f32 %v1380_v60, %v5160_v61  ;;  %v3952_v8 = vpop.f32.mrf.mxu0 }
 0x149   : > { %v3902_v18 = vpop.f32.mrf.mxu1 }
 0x14a   : > { %v5352_v28 = vadd.f32 %v1648_v49, %v1507_v0  ;;  %v1510_v38 = vadd.f32 %v3902_v18, %v5168_v19  ;;  %v1658_v55 = vpop.f32.mrf.mxu0 }
 0x14b   : > { %v1390_v41 = vpop.f32.mrf.mxu1 }
 0x14c   : > { %v5355_v14 = vadd.f32 %v3952_v8, %v1510_v38  ;;  %v1509_v42 = vadd.f32 %v1390_v41, %v5176_v3  ;;  %v3955_v1 = vpop.f32.mrf.mxu0 }
 0x14d   : > { %v3905_v29 = vpop.f32.mrf.mxu1 }
 0x14e   : > { %v5358_v2 = vadd.f32 %v1658_v55, %v1509_v42  ;;  %v1512_v7 = vadd.f32 %v3905_v29, %v5184_v20  ;;  %v1668_v61 = vpop.f32.mrf.mxu0 }
 0x14f   : > { %v1400_v24 = vpop.f32.mrf.mxu1 }
 0x150   : > { %v5361_v30 = vadd.f32 %v3955_v1, %v1512_v7  ;;  %v1511_v48 = vadd.f32 %v1400_v24, %v5192_v11  ;;  %v3958_v19 = vpop.f32.mrf.mxu0 }
 0x151   : > { %v3908_v10 = vpop.f32.mrf.mxu1 }
 0x152   : > { %v5364_v31 = vadd.f32 %v1668_v61, %v1511_v48  ;;  %v1514_v50 = vadd.f32 %v3908_v10, %v5200_v21  ;;  %v1678_v3 = vpop.f32.mrf.mxu0 }
 0x153   : > { %v1410_v37 = vpop.f32.mrf.mxu1 }
 0x154   : > { %v5367_v53 = vadd.f32 %v3958_v19, %v1514_v50  ;;  %v1513_v13 = vadd.f32 %v1410_v37, %v5208_v16  ;;  %v3961_v20 = vpop.f32.mrf.mxu0 }
 0x155   : > { %v3911_v12 = vpop.f32.mrf.mxu1 }
 0x156   : > { %v5370_v26 = vadd.f32 %v1678_v3, %v1513_v13  ;;  %v1516_v56 = vadd.f32 %v3911_v12, %v5216_v34  ;;  %v1688_v11 = vpop.f32.mrf.mxu0 }
 0x157   : > { %v1420_v43 = vpop.f32.mrf.mxu1 }
 0x158   : > { %v5373_v4 = vadd.f32 %v3961_v20, %v1516_v56  ;;  %v1515_v59 = vadd.f32 %v1420_v43, %v5224_v39  ;;  %v3964_v21 = vpop.f32.mrf.mxu0 }
 0x159   : > { %v3914_v6 = vpop.f32.mrf.mxu1 }
 0x15a   : > { %v5376_v35 = vadd.f32 %v1688_v11, %v1515_v59  ;;  %v1518_v60 = vadd.f32 %v3914_v6, %v5232_v52  ;;  %v1698_v16 = vpop.f32.mrf.mxu0 }
 0x15b   : > { %v1430_v49 = vpop.f32.mrf.mxu1 }
 0x15c   : > { %v5379_v0 = vadd.f32 %v3964_v21, %v1518_v60  ;;  %v1517_v18 = vadd.f32 %v1430_v49, %v5240_v45  ;;  %v3967_v34 = vpop.f32.mrf.mxu0 }
 0x15d   : > { %v3917_v8 = vpop.f32.mrf.mxu1 }
 0x15e   : > { %5741 = vst [vmem:[#allocation4_spill] sm:$0xff] %v5379_v0  ;;  %v5382_v38 = vadd.f32 %v1698_v16, %v1517_v18  ;;  %v1520_v41 = vadd.f32 %v3917_v8, %v5248_v5  ;;  %v1708_v39 = vpop.f32.mrf.mxu0 }
 0x15f   : > { %v1440_v55 = vpop.f32.mrf.mxu1 }
 0x160   : > { %5742 = vst [vmem:[#allocation2_spill] sm:$0xff] %v5382_v38  ;;  %v5385_v42 = vadd.f32 %v3967_v34, %v1520_v41  ;;  %v1519_v29 = vadd.f32 %v1440_v55, %v5256_v51  ;;  %v3970_v52 = vpop.f32.mrf.mxu0 }
 0x161   : > { %v3920_v1 = vpop.f32.mrf.mxu1 }
 0x162   : > { %5743 = vst [vmem:[#allocation6_spill] sm:$0xff] %v5385_v42  ;;  %v5388_v7 = vadd.f32 %v1708_v39, %v1519_v29  ;;  %v1522_v24 = vadd.f32 %v3920_v1, %v5264_v58  ;;  %v1718_v45 = vpop.f32.mrf.mxu0 }
 0x163   : > { %v1450_v61 = vpop.f32.mrf.mxu1 }
 0x164   : > { %5744 = vst [vmem:[#allocation3_spill] sm:$0xff] %v5388_v7  ;;  %v5391_v48 = vadd.f32 %v3970_v52, %v1522_v24  ;;  %v1521_v10 = vadd.f32 %v1450_v61, %v5272_v46  ;;  %v3973_v5 = vpop.f32.mrf.mxu0 }
 0x165   : > { %v3923_v19 = vpop.f32.mrf.mxu1 }
 0x166   : > { %5745 = vst [vmem:[#allocation5_spill] sm:$0xff] %v5391_v48  ;;  %v5394_v50 = vadd.f32 %v1718_v45, %v1521_v10  ;;  %v1524_v37 = vadd.f32 %v3923_v19, %v5281_v36  ;;  %v1728_v51 = vpop.f32.mrf.mxu0 }
 0x167   : > { %v1460_v3 = vpop.f32.mrf.mxu1 }
 0x168   : > { %5746 = vst [vmem:[#allocation7_spill] sm:$0xff] %v5394_v50  ;;  %v5397_v13 = vadd.f32 %v3973_v5, %v1524_v37  ;;  %v1523_v12 = vadd.f32 %v1460_v3, %v5289_v23  ;;  %v3976_v58 = vpop.f32.mrf.mxu0 }
 0x169   : > { %v3926_v20 = vpop.f32.mrf.mxu1 }
 0x16a   : > { %5747 = vst [vmem:[#allocation8_spill] sm:$0xff] %v5397_v13  ;;  %v5400_v56 = vadd.f32 %v1728_v51, %v1523_v12  ;;  %v1526_v43 = vadd.f32 %v3926_v20, %v5298_v44  ;;  %v1738_v46 = vpop.f32.mrf.mxu0 }
 0x16b   : > { %v1470_v11 = vpop.f32.mrf.mxu1 }
 0x16c   : > { %5748 = vst [vmem:[#allocation9_spill] sm:$0xff] %v5400_v56  ;;  %v5403_v59 = vadd.f32 %v3976_v58, %v1526_v43  ;;  %v1525_v6 = vadd.f32 %v1470_v11, %v5305_v25  ;;  %v3979_v36 = vpop.f32.mrf.mxu0 }
 0x16d   : > { %v3929_v21 = vpop.f32.mrf.mxu1 }
 0x16e   : > { %5749 = vst [vmem:[#allocation10_spill] sm:$0xff] %v5403_v59  ;;  %v5406_v60 = vadd.f32 %v1738_v46, %v1525_v6  ;;  %v1528_v49 = vadd.f32 %v3929_v21, %v5312_v32  ;;  %v1748_v23 = vpop.f32.mrf.mxu0 }
 0x16f   : > { %v1480_v16 = vpop.f32.mrf.mxu1 }
 0x170   : > { %5750 = vst [vmem:[#allocation11_spill] sm:$0xff] %v5406_v60  ;;  %v5409_v18 = vadd.f32 %v3979_v36, %v1528_v49  ;;  %v1527_v8 = vadd.f32 %v1480_v16, %v5318_v33  ;;  %v3982_v44 = vpop.f32.mrf.mxu0 }
 0x171   : > { %v3932_v34 = vpop.f32.mrf.mxu1 }
 0x172   : > { %5751 = vst [vmem:[#allocation12_spill] sm:$0xff] %v5409_v18  ;;  %v5412_v41 = vadd.f32 %v1748_v23, %v1527_v8  ;;  %v1530_v55 = vadd.f32 %v3932_v34, %v5320_v27  ;;  %v1758_v25 = vpop.f32.mrf.mxu0 }
 0x173   : > { %v1490_v39 = vpop.f32.mrf.mxu1 }
 0x174   : > { %5752 = vst [vmem:[#allocation13_spill] sm:$0xff] %v5412_v41  ;;  %v5415_v29 = vadd.f32 %v3982_v44, %v1530_v55  ;;  %v1529_v1 = vadd.f32 %v1490_v39, %v5322_v63  ;;  %v5418_v32 = vpop.f32.mrf.mxu0 }
 0x175   : > { %v3987_v52 = vpop.f32.mrf.mxu1 }
 0x176   : > { %5753 = vst [vmem:[#allocation14_spill] sm:$0xff] %v5415_v29  ;;  %v5420_v24 = vadd.f32 %v1758_v25, %v1529_v1  ;;  %v5422_v45 = vpop.f32.mrf.mxu0 }
 0x177   : > { %v1876_v61 = vpop.f32.mrf.mxu1 }
 0x178   : > { %5754 = vst [vmem:[#allocation15_spill] sm:$0xff] %v5420_v24  ;;  %v5426_v10 = vpop.f32.mrf.mxu0 }
 0x179   : > { %v5424_v33 = vpop.f32.mrf.mxu1 }
 0x17a   : > { %v5430_v27 = vpop.f32.mrf.mxu0 }
 0x17b   : > { %v5428_v19 = vpop.f32.mrf.mxu1 }
 0x17c   : > { %v5434_v37 = vpop.f32.mrf.mxu0 }
 0x17d   : > { %v5432_v5 = vpop.f32.mrf.mxu1 }
 0x17e   : > { %v5438_v3 = vpop.f32.mrf.mxu0 }
 0x17f   : > { %v5436_v63 = vpop.f32.mrf.mxu1 }
 0x180   : > { %v5442_v12 = vpop.f32.mrf.mxu0 }
 0x181   : > { %v5440_v51 = vpop.f32.mrf.mxu1 }
 0x182   : > { %v5446_v58 = vpop.f32.mrf.mxu0 }
 0x183   : > { %v5444_v20 = vpop.f32.mrf.mxu1 }
 0x184   : > { %v5450_v11 = vpop.f32.mrf.mxu0 }
 0x185   : > { %v5448_v43 = vpop.f32.mrf.mxu1 }
 0x186   : > { %v5454_v6 = vpop.f32.mrf.mxu0 }
 0x187   : > { %v5452_v46 = vpop.f32.mrf.mxu1 }
 0x188   : > { %v5458_v36 = vpop.f32.mrf.mxu0 }
 0x189   : > { %v5456_v21 = vpop.f32.mrf.mxu1 }
 0x18a   : > { %v5462_v16 = vpop.f32.mrf.mxu0 }
 0x18b   : > { %v5460_v49 = vpop.f32.mrf.mxu1 }
 0x18c   : > { %v5466_v8 = vpop.f32.mrf.mxu0 }
 0x18d   : > { %v5464_v23 = vpop.f32.mrf.mxu1 }
 0x18e   : > { %v5470_v44 = vpop.f32.mrf.mxu0 }
 0x18f   : > { %v5468_v34 = vpop.f32.mrf.mxu1 }
 0x190   : > { %v5474_v39 = vpop.f32.mrf.mxu0 }
 0x191   : > { %v5472_v55 = vpop.f32.mrf.mxu1 }
 0x192   : > { %v5478_v1 = vpop.f32.mrf.mxu0 }
 0x193   : > { %v5476_v25 = vpop.f32.mrf.mxu1 }
 0x194   : > { %v5482_v29 = vpop.f32.mrf.mxu0 }
 0x195   : > { %v5480_v24 = vpop.f32.mrf.mxu1 }
 0x196   : > { %v5486_v18 = vpop.f32.mrf.mxu0 }
 0x197   : > { %v5484_v41 = vpop.f32.mrf.mxu1  ;;  %5755 = vst [vmem:[#allocation16_spill] sm:$0xff] %v5486_v18 }
 0x198   : > { %v5490_v59 = vpop.f32.mrf.mxu0 }
 0x199   : > { %v5488_v60 = vpop.f32.mrf.mxu1  ;;  %5757 = vst [vmem:[#allocation18_spill] sm:$0xff] %v5490_v59 }
 0x19a   : > { %5756 = vst [vmem:[#allocation17_spill] sm:$0xff] %v5488_v60  ;;  %v5494_v13 = vpop.f32.mrf.mxu0 }
 0x19b   : > { %v5492_v56 = vpop.f32.mrf.mxu1  ;;  %5759 = vst [vmem:[#allocation20_spill] sm:$0xff] %v5494_v13 }
 0x19c   : > { %5758 = vst [vmem:[#allocation19_spill] sm:$0xff] %v5492_v56  ;;  %v5498_v48 = vpop.f32.mrf.mxu0 }
 0x19d   : > { %v5496_v50 = vpop.f32.mrf.mxu1  ;;  %5761 = vst [vmem:[#allocation22_spill] sm:$0xff] %v5498_v48 }
 0x19e   : > { %5760 = vst [vmem:[#allocation21_spill] sm:$0xff] %v5496_v50  ;;  %v5502_v42 = vpop.f32.mrf.mxu0 }
 0x19f   : > { %v5500_v7 = vpop.f32.mrf.mxu1  ;;  %5763 = vst [vmem:[#allocation24_spill] sm:$0xff] %v5502_v42 }
 0x1a0   : > { %5762 = vst [vmem:[#allocation23_spill] sm:$0xff] %v5500_v7  ;;  %v5506_v0 = vpop.f32.mrf.mxu0 }
 0x1a1   : > { %v5504_v38 = vpop.f32.mrf.mxu1  ;;  %5765 = vst [vmem:[#allocation26_spill] sm:$0xff] %v5506_v0 }
 0x1a2   : > { %5764 = vst [vmem:[#allocation25_spill] sm:$0xff] %v5504_v38  ;;  %v5510_v60 = vpop.f32.mrf.mxu0 }
 0x1a3   : > { %v5508_v18 = vpop.f32.mrf.mxu1  ;;  %5767 = vst [vmem:[#allocation28_spill] sm:$0xff] %v5510_v60 }
 0x1a4   : > { %5766 = vst [vmem:[#allocation27_spill] sm:$0xff] %v5508_v18  ;;  %v5514_v56 = vpop.f32.mrf.mxu0 }
 0x1a5   : > { %v5512_v59 = vpop.f32.mrf.mxu1  ;;  %5769 = vst [vmem:[#allocation30_spill] sm:$0xff] %v5514_v56 }
 0x1a6   : > { %5768 = vst [vmem:[#allocation29_spill] sm:$0xff] %v5512_v59  ;;  %v5518_v50 = vpop.f32.mrf.mxu0 }
 0x1a7   : > { %v5516_v13 = vpop.f32.mrf.mxu1  ;;  %5771 = vst [vmem:[#allocation32_spill] sm:$0xff] %v5518_v50 }
 0x1a8   : > { %5770 = vst [vmem:[#allocation31_spill] sm:$0xff] %v5516_v13  ;;  %v5522_v42 = vpop.f32.mrf.mxu0  ;;  %v2036_v13 = vadd.f32 %v3987_v52, %v5325_v15  ;;  %v2037_v52 = vadd.f32 %v5428_v19, %v5334_v9 }
 0x1a9   : > { %v5520_v48 = vpop.f32.mrf.mxu1  ;;  %5773 = vst [vmem:[#allocation34_spill] sm:$0xff] %v5522_v42  ;;  %v2035_v42 = vadd.f32 %v1876_v61, %v5328_v40 }
 0x1aa   : > { %5772 = vst [vmem:[#allocation33_spill] sm:$0xff] %v5520_v48  ;;  %v5526_v0 = vpop.f32.mrf.mxu0 }
 0x1ab   : > { %v5524_v38 = vpop.f32.mrf.mxu1  ;;  %5775 = vst [vmem:[#allocation36_spill] sm:$0xff] %v5526_v0  ;;  %v2430_v0 = vadd.f32 %v5418_v32, %v2036_v13  ;;  %v2429_v15 = vadd.f32 %v5422_v45, %v2035_v42  ;;  %v2040_v32 = vadd.f32 %v5432_v5, %v5337_v17  ;;  %v2042_v17 = vadd.f32 %v5440_v51, %v5343_v57 }
 0x1ac   : > { %5774 = vst [vmem:[#allocation35_spill] sm:$0xff] %v5524_v38  ;;  %v5530_v60 = vpop.f32.mrf.mxu0  ;;  %v2041_v5 = vadd.f32 %v5444_v20, %v5346_v22 }
 0x1ad   : > { %v5528_v18 = vpop.f32.mrf.mxu1  ;;  %5776 = vst [vmem:[#allocation37_spill] sm:$0xff] %v5530_v60  ;;  %v2038_v60 = vadd.f32 %v5424_v33, %v5331_v47  ;;  %v2436_v57 = vadd.f32 %v5442_v12, %v2042_v17 }
 0x1ae   : > { %v5534_v56 = vpop.f32.mrf.mxu0  ;;  %v2435_v22 = vadd.f32 %v5446_v58, %v2041_v5 }
 0x1af   : > { %v5532_v59 = vpop.f32.mrf.mxu1  ;;  %5778 = vst [vmem:[#allocation39_spill] sm:$0xff] %v5534_v56  ;;  %v2432_v47 = vadd.f32 %v5426_v10, %v2038_v60  ;;  %v2434_v60 = vadd.f32 %v5434_v37, %v2040_v32 }
 0x1b0   : > { %5777 = vst [vmem:[#allocation38_spill] sm:$0xff] %v5532_v59  ;;  %v5539_v48 = vpop.f32.mrf.mxu0 }
 0x1b1   : > { %v5537_v50 = vpop.f32.mrf.mxu1  ;;  %5779 = vst [vmem:[#allocation40_spill] sm:$0xff] %v5539_v48 }
 0x1b2   : > { %v5544_v38 = vpop.f32.mrf.mxu0 }
 0x1b3   : > { %v5542_v7 = vpop.f32.mrf.mxu1  ;;  %5781 = vst [vmem:[#allocation42_spill] sm:$0xff] %v5544_v38 }
 0x1b4   : > { %5780 = vst [vmem:[#allocation41_spill] sm:$0xff] %v5542_v7  ;;  %v4137_v56 = vpop.f32.mrf.mxu0 }
 0x1b5   : > { %v4087_v59 = vpop.f32.mrf.mxu1 }
 0x1b6   : > { %v2698_v48 = vadd.f32 %v4087_v59, %v2430_v0  ;;  %v2806_v13 = vpop.f32.mrf.mxu0  ;;  %v2431_v0 = vadd.f32 %v5430_v27, %v2037_v52  ;;  %v2039_v59 = vadd.f32 %v5436_v63, %v5340_v54 }
 0x1b7   : > { %v2538_v40 = vpop.f32.mrf.mxu1 }
 0x1b8   : > { %v2966_v42 = vadd.f32 %v4137_v56, %v2698_v48  ;;  %v2697_v61 = vadd.f32 %v2538_v40, %v2429_v15  ;;  %v4140_v9 = vpop.f32.mrf.mxu0  ;;  %v2433_v54 = vadd.f32 %v5438_v3, %v2039_v59 }
 0x1b9   : > { %v4090_v45 = vpop.f32.mrf.mxu1 }
 0x1ba   : > { %2999 = vst.msk [vmem:[%s5556_s20 + $0x8] sm:$0xff] %vm2997_vm2, %v2966_v42  ;;  %v2965_v33 = vadd.f32 %v2806_v13, %v2697_v61  ;;  %v2700_v19 = vadd.f32 %v4090_v45, %v2432_v47  ;;  %v2816_v7 = vpop.f32.mrf.mxu0 }
 0x1bb   : > { %v2548_v38 = vpop.f32.mrf.mxu1 }
 0x1bc   : > { %2998 = vst.msk [vmem:[%s5556_s20] sm:$0xff] %vm2997_vm2, %v2965_v33  ;;  %v2968_v48 = vadd.f32 %v4140_v9, %v2700_v19  ;;  %v2699_v56 = vadd.f32 %v2548_v38, %v2431_v0  ;;  %v4143_v27 = vpop.f32.mrf.mxu0  ;;  %v2044_v38 = vadd.f32 %v5448_v43, %v5349_v62  ;;  %v2046_v43 = vadd.f32 %v5456_v21, %v5355_v14 }
 0x1bd   : > { %v4093_v10 = vpop.f32.mrf.mxu1  ;;  %v2048_v21 = vadd.f32 %v5464_v23, %v5361_v30  ;;  %v2050_v23 = vadd.f32 %v5472_v55, %v5367_v53  ;;  %v2052_v55 = vadd.f32 %v5480_v24, %v5373_v4  ;;  %v5782_v24 = vld [vmem:[#allocation4_spill] sm:$0xff] }
 0x1be   : > { %3001 = vst.msk [vmem:[%s5556_s20 + $0x18] sm:$0xff] %vm2997_vm2, %v2968_v48  ;;  %v2967_v63 = vadd.f32 %v2816_v7, %v2699_v56  ;;  %v2702_v37 = vadd.f32 %v4093_v10, %v2434_v60  ;;  %v2826_v52 = vpop.f32.mrf.mxu0  ;;  %v2043_v7 = vadd.f32 %v5452_v46, %v5352_v28  ;;  %v2438_v62 = vadd.f32 %v5450_v11, %v2044_v38 }
 0x1bf   : > { %v2558_v15 = vpop.f32.mrf.mxu1  ;;  %v2045_v46 = vadd.f32 %v5460_v49, %v5358_v2  ;;  %v2440_v14 = vadd.f32 %v5458_v36, %v2046_v43  ;;  %v2047_v49 = vadd.f32 %v5468_v34, %v5364_v31  ;;  %v2442_v30 = vadd.f32 %v5466_v8, %v2048_v21 }
 0x1c0   : > { %3000 = vst.msk [vmem:[%s5556_s20 + $0x10] sm:$0xff] %vm2997_vm2, %v2967_v63  ;;  %v2970_v51 = vadd.f32 %v4143_v27, %v2702_v37  ;;  %v2701_v3 = vadd.f32 %v2558_v15, %v2433_v54  ;;  %v4146_v13 = vpop.f32.mrf.mxu0  ;;  %v2437_v28 = vadd.f32 %v5454_v6, %v2043_v7  ;;  %v2049_v34 = vadd.f32 %v5476_v25, %v5370_v26 }
 0x1c1   : > { %v4096_v40 = vpop.f32.mrf.mxu1  ;;  %v2439_v2 = vadd.f32 %v5462_v16, %v2045_v46  ;;  %v2441_v31 = vadd.f32 %v5470_v44, %v2047_v49  ;;  %v2444_v53 = vadd.f32 %v5474_v39, %v2050_v23  ;;  %v2051_v25 = vadd.f32 %v5484_v41, %v5376_v35  ;;  %v5785_v41 = vld [vmem:[#allocation2_spill] sm:$0xff] }
 0x1c2   : > { %3003 = vst.msk [vmem:[%s5556_s20 + $0x28] sm:$0xff] %vm2997_vm2, %v2970_v51  ;;  %v2969_v20 = vadd.f32 %v2826_v52, %v2701_v3  ;;  %v2704_v12 = vadd.f32 %v4096_v40, %v2436_v57  ;;  %v2836_v32 = vpop.f32.mrf.mxu0  ;;  %v2443_v26 = vadd.f32 %v5478_v1, %v2049_v34  ;;  %v2446_v4 = vadd.f32 %v5482_v29, %v2052_v55  ;;  %v5783_v40 = vld [vmem:[#allocation17_spill] sm:$0xff] }
 0x1c3   : > { %v2568_v47 = vpop.f32.mrf.mxu1 }
 0x1c4   : > { %3002 = vst.msk [vmem:[%s5556_s20 + $0x20] sm:$0xff] %vm2997_vm2, %v2969_v20  ;;  %v2972_v42 = vadd.f32 %v4146_v13, %v2704_v12  ;;  %v2703_v58 = vadd.f32 %v2568_v47, %v2435_v22  ;;  %v4149_v45 = vpop.f32.mrf.mxu0  ;;  %v2054_v13 = vadd.f32 %v5783_v40, %v5782_v24  ;;  %v5784_v12 = vld [vmem:[#allocation16_spill] sm:$0xff]  ;;  %v5786_v47 = vld [vmem:[#allocation19_spill] sm:$0xff]  ;;  %v5803_v40 = vld [vmem:[#allocation9_spill] sm:$0xff] }
 0x1c5   : > { %v4099_v61 = vpop.f32.mrf.mxu1  ;;  %v2445_v35 = vadd.f32 %v5784_v12, %v2051_v25 }
 0x1c6   : > { %3005 = vst.msk [vmem:[%s5556_s20 + $0x38] sm:$0xff] %vm2997_vm2, %v2972_v42  ;;  %v2971_v9 = vadd.f32 %v2836_v32, %v2703_v58  ;;  %v2706_v11 = vadd.f32 %v4099_v61, %v2438_v62  ;;  %v2846_v59 = vpop.f32.mrf.mxu0  ;;  %v2053_v32 = vadd.f32 %v5786_v47, %v5785_v41  ;;  %v5787_v58 = vld [vmem:[#allocation18_spill] sm:$0xff] }
 0x1c7   : > { %v2578_v0 = vpop.f32.mrf.mxu1  ;;  %v2448_v61 = vadd.f32 %v5787_v58, %v2054_v13  ;;  %v5804_v13 = vld [vmem:[#allocation31_spill] sm:$0xff]  ;;  %v5806_v47 = vld [vmem:[#allocation10_spill] sm:$0xff] }
 0x1c8   : > { %3004 = vst.msk [vmem:[%s5556_s20 + $0x30] sm:$0xff] %vm2997_vm2, %v2971_v9  ;;  %v2974_v33 = vadd.f32 %v4149_v45, %v2706_v11  ;;  %v2705_v6 = vadd.f32 %v2578_v0, %v2437_v28  ;;  %v4152_v60 = vpop.f32.mrf.mxu0  ;;  %v5788_v45 = vld [vmem:[#allocation6_spill] sm:$0xff]  ;;  %v5789_v28 = vld [vmem:[#allocation21_spill] sm:$0xff] }
 0x1c9   : > { %v4102_v19 = vpop.f32.mrf.mxu1  ;;  %v2056_v46 = vadd.f32 %v5789_v28, %v5788_v45  ;;  %v5809_v28 = vld [vmem:[#allocation11_spill] sm:$0xff] }
 0x1ca   : > { %3007 = vst.msk [vmem:[%s5556_s20 + $0x48] sm:$0xff] %vm2997_vm2, %v2974_v33  ;;  %v2973_v17 = vadd.f32 %v2846_v59, %v2705_v6  ;;  %v2708_v36 = vadd.f32 %v4102_v19, %v2440_v14  ;;  %v2856_v56 = vpop.f32.mrf.mxu0  ;;  %v5790_v14 = vld [vmem:[#allocation20_spill] sm:$0xff]  ;;  %v5791_v33 = vld [vmem:[#allocation3_spill] sm:$0xff] }
 0x1cb   : > { %v2588_v48 = vpop.f32.mrf.mxu1  ;;  %v2447_v21 = vadd.f32 %v5790_v14, %v2053_v32  ;;  %v5792_v6 = vld [vmem:[#allocation23_spill] sm:$0xff]  ;;  %v5807_v32 = vld [vmem:[#allocation33_spill] sm:$0xff] }
 0x1cc   : > { %3006 = vst.msk [vmem:[%s5556_s20 + $0x40] sm:$0xff] %vm2997_vm2, %v2973_v17  ;;  %v2976_v10 = vadd.f32 %v4152_v60, %v2708_v36  ;;  %v2707_v16 = vadd.f32 %v2588_v48, %v2439_v2  ;;  %v4155_v54 = vpop.f32.mrf.mxu0  ;;  %v2055_v19 = vadd.f32 %v5792_v6, %v5791_v33  ;;  %v5793_v36 = vld [vmem:[#allocation22_spill] sm:$0xff]  ;;  %v5812_v6 = vld [vmem:[#allocation12_spill] sm:$0xff] }
 0x1cd   : > { %v4105_v27 = vpop.f32.mrf.mxu1  ;;  %v2450_v48 = vadd.f32 %v5793_v36, %v2056_v46  ;;  %v5810_v46 = vld [vmem:[#allocation35_spill] sm:$0xff]  ;;  %v5813_v36 = vld [vmem:[#allocation36_spill] sm:$0xff] }
 0x1ce   : > { %3009 = vst.msk [vmem:[%s5556_s20 + $0x58] sm:$0xff] %vm2997_vm2, %v2976_v10  ;;  %v2975_v5 = vadd.f32 %v2856_v56, %v2707_v16  ;;  %v2710_v8 = vadd.f32 %v4105_v27, %v2442_v30  ;;  %v2866_v37 = vpop.f32.mrf.mxu0  ;;  %v5794_v56 = vld [vmem:[#allocation5_spill] sm:$0xff] }
 0x1cf   : > { %v2598_v63 = vpop.f32.mrf.mxu1  ;;  %v5795_v30 = vld [vmem:[#allocation25_spill] sm:$0xff] }
 0x1d0   : > { %3008 = vst.msk [vmem:[%s5556_s20 + $0x50] sm:$0xff] %vm2997_vm2, %v2975_v5  ;;  %v2978_v15 = vadd.f32 %v4155_v54, %v2710_v8  ;;  %v2709_v44 = vadd.f32 %v2598_v63, %v2441_v31  ;;  %v4158_v57 = vpop.f32.mrf.mxu0  ;;  %v2058_v23 = vadd.f32 %v5795_v30, %v5794_v56  ;;  %v5796_v31 = vld [vmem:[#allocation24_spill] sm:$0xff]  ;;  %v5797_v5 = vld [vmem:[#allocation7_spill] sm:$0xff]  ;;  %v5814_v56 = vld [vmem:[#allocation13_spill] sm:$0xff] }
 0x1d1   : > { %v4108_v52 = vpop.f32.mrf.mxu1  ;;  %v2449_v34 = vadd.f32 %v5796_v31, %v2055_v19  ;;  %v5798_v8 = vld [vmem:[#allocation27_spill] sm:$0xff]  ;;  %v2064_v19 = vadd.f32 %v5528_v18, %v5812_v6  ;;  %v5815_v30 = vld [vmem:[#allocation38_spill] sm:$0xff]  ;;  %v5816_v31 = vld [vmem:[#allocation37_spill] sm:$0xff] }
 0x1d2   : > { %3011 = vst.msk [vmem:[%s5556_s20 + $0x68] sm:$0xff] %vm2997_vm2, %v2978_v15  ;;  %v2977_v38 = vadd.f32 %v2866_v37, %v2709_v44  ;;  %v2712_v39 = vadd.f32 %v4108_v52, %v2444_v53  ;;  %v2876_v3 = vpop.f32.mrf.mxu0  ;;  %v2057_v63 = vadd.f32 %v5798_v8, %v5797_v5  ;;  %v5799_v44 = vld [vmem:[#allocation26_spill] sm:$0xff] }
 0x1d3   : > { %v2608_v51 = vpop.f32.mrf.mxu1  ;;  %v2452_v52 = vadd.f32 %v5799_v44, %v2058_v23  ;;  %v2063_v23 = vadd.f32 %v5815_v30, %v5814_v56  ;;  %v2458_v18 = vadd.f32 %v5816_v31, %v2064_v19  ;;  %v5819_v44 = vld [vmem:[#allocation15_spill] sm:$0xff] }
 0x1d4   : > { %3010 = vst.msk [vmem:[%s5556_s20 + $0x60] sm:$0xff] %vm2997_vm2, %v2977_v38  ;;  %v2980_v22 = vadd.f32 %v4158_v57, %v2712_v39  ;;  %v2711_v1 = vadd.f32 %v2608_v51, %v2443_v26  ;;  %v4161_v20 = vpop.f32.mrf.mxu0  ;;  %v5800_v57 = vld [vmem:[#allocation8_spill] sm:$0xff]  ;;  %v5801_v26 = vld [vmem:[#allocation29_spill] sm:$0xff] }
 0x1d5   : > { %v4111_v7 = vpop.f32.mrf.mxu1  ;;  %v2060_v25 = vadd.f32 %v5801_v26, %v5800_v57 }
 0x1d6   : > { %3013 = vst.msk [vmem:[%s5556_s20 + $0x78] sm:$0xff] %vm2997_vm2, %v2980_v22  ;;  %v2979_v62 = vadd.f32 %v2876_v3, %v2711_v1  ;;  %v2714_v29 = vadd.f32 %v4111_v7, %v2446_v4  ;;  %v2886_v42 = vpop.f32.mrf.mxu0  ;;  %v5802_v4 = vld [vmem:[#allocation28_spill] sm:$0xff]  ;;  %v2059_v22 = vadd.f32 %v5804_v13, %v5803_v40  ;;  %v5822_v13 = vld [vmem:[#allocation42_spill] sm:$0xff] }
 0x1d7   : > { %v2618_v43 = vpop.f32.mrf.mxu1  ;;  %v2451_v24 = vadd.f32 %v5802_v4, %v2057_v63 }
 0x1d8   : > { %3012 = vst.msk [vmem:[%s5556_s20 + $0x70] sm:$0xff] %vm2997_vm2, %v2979_v62  ;;  %v2982_v9 = vadd.f32 %v4161_v20, %v2714_v29  ;;  %v2713_v11 = vadd.f32 %v2618_v43, %v2445_v35  ;;  %v4164_v59 = vpop.f32.mrf.mxu0  ;;  %v5805_v35 = vld [vmem:[#allocation30_spill] sm:$0xff]  ;;  %v2062_v62 = vadd.f32 %v5807_v32, %v5806_v47 }
 0x1d9   : > { %v4114_v0 = vpop.f32.mrf.mxu1  ;;  %v2454_v41 = vadd.f32 %v5805_v35, %v2060_v25 }
 0x1da   : > { %3015 = vst.msk [vmem:[%s5556_s20 + $0x88] sm:$0xff] %vm2997_vm2, %v2982_v9  ;;  %v2981_v60 = vadd.f32 %v2886_v42, %v2713_v11  ;;  %v2716_v2 = vadd.f32 %v4114_v0, %v2448_v61  ;;  %v2896_v17 = vpop.f32.mrf.mxu0  ;;  %v5808_v61 = vld [vmem:[#allocation32_spill] sm:$0xff]  ;;  %v2061_v9 = vadd.f32 %v5810_v46, %v5809_v28 }
 0x1db   : > { %v2628_v49 = vpop.f32.mrf.mxu1  ;;  %v2453_v45 = vadd.f32 %v5808_v61, %v2059_v22 }
 0x1dc   : > { %3014 = vst.msk [vmem:[%s5556_s20 + $0x80] sm:$0xff] %vm2997_vm2, %v2981_v60  ;;  %v2984_v10 = vadd.f32 %v4164_v59, %v2716_v2  ;;  %v2715_v16 = vadd.f32 %v2628_v49, %v2447_v21  ;;  %v4167_v54 = vpop.f32.mrf.mxu0  ;;  %v5811_v21 = vld [vmem:[#allocation34_spill] sm:$0xff] }
 0x1dd   : > { %v4117_v27 = vpop.f32.mrf.mxu1  ;;  %v2456_v33 = vadd.f32 %v5811_v21, %v2062_v62 }
 0x1de   : > { %3017 = vst.msk [vmem:[%s5556_s20 + $0x98] sm:$0xff] %vm2997_vm2, %v2984_v10  ;;  %v2983_v37 = vadd.f32 %v2896_v17, %v2715_v16  ;;  %v2718_v53 = vadd.f32 %v4117_v27, %v2450_v48  ;;  %v2906_v15 = vpop.f32.mrf.mxu0  ;;  %v2455_v48 = vadd.f32 %v5813_v36, %v2061_v9 }
 0x1df   : > { %v2638_v55 = vpop.f32.mrf.mxu1 }
 0x1e0   : > { %3016 = vst.msk [vmem:[%s5556_s20 + $0x90] sm:$0xff] %vm2997_vm2, %v2983_v37  ;;  %v2986_v38 = vadd.f32 %v4167_v54, %v2718_v53  ;;  %v2717_v39 = vadd.f32 %v2638_v55, %v2449_v34  ;;  %v4170_v3 = vpop.f32.mrf.mxu0  ;;  %v5817_v34 = vld [vmem:[#allocation14_spill] sm:$0xff]  ;;  %v5818_v55 = vld [vmem:[#allocation39_spill] sm:$0xff] }
 0x1e1   : > { %v4120_v51 = vpop.f32.mrf.mxu1  ;;  %v2066_v5 = vadd.f32 %v5537_v50, %v5817_v34  ;;  %v5821_v50 = vld [vmem:[#allocation40_spill] sm:$0xff] }
 0x1e2   : > { %3019 = vst.msk [vmem:[%s5556_s20 + $0xa8] sm:$0xff] %vm2997_vm2, %v2986_v38  ;;  %v2985_v1 = vadd.f32 %v2906_v15, %v2717_v39  ;;  %v2720_v7 = vadd.f32 %v4120_v51, %v2452_v52  ;;  %v2916_v12 = vpop.f32.mrf.mxu0  ;;  %v2457_v15 = vadd.f32 %v5818_v55, %v2063_v23  ;;  %v5820_v52 = vld [vmem:[#allocation41_spill] sm:$0xff] }
 0x1e3   : > { %v2648_v20 = vpop.f32.mrf.mxu1  ;;  %v2065_v57 = vadd.f32 %v5820_v52, %v5819_v44  ;;  %v2460_v51 = vadd.f32 %v5821_v50, %v2066_v5 }
 0x1e4   : > { %3018 = vst.msk [vmem:[%s5556_s20 + $0xa0] sm:$0xff] %vm2997_vm2, %v2985_v1  ;;  %v2988_v29 = vadd.f32 %v4170_v3, %v2720_v7  ;;  %v2719_v43 = vadd.f32 %v2648_v20, %v2451_v24  ;;  %v4173_v58 = vpop.f32.mrf.mxu0 }
 0x1e5   : > { %v4123_v42 = vpop.f32.mrf.mxu1  ;;  %v2459_v22 = vadd.f32 %v5822_v13, %v2065_v57 }
 0x1e6   : > { %3021 = vst.msk [vmem:[%s5556_s20 + $0xb8] sm:$0xff] %vm2997_vm2, %v2988_v29  ;;  %v2987_v11 = vadd.f32 %v2916_v12, %v2719_v43  ;;  %v2722_v0 = vadd.f32 %v4123_v42, %v2454_v41  ;;  %v2926_v14 = vpop.f32.mrf.mxu0 }
 0x1e7   : > { %v2658_v59 = vpop.f32.mrf.mxu1 }
 0x1e8   : > { %3020 = vst.msk [vmem:[%s5556_s20 + $0xb0] sm:$0xff] %vm2997_vm2, %v2987_v11  ;;  %v2990_v60 = vadd.f32 %v4173_v58, %v2722_v0  ;;  %v2721_v2 = vadd.f32 %v2658_v59, %v2453_v45  ;;  %v4176_v17 = vpop.f32.mrf.mxu0 }
 0x1e9   : > { %v4126_v49 = vpop.f32.mrf.mxu1 }
 0x1ea   : > { %3023 = vst.msk [vmem:[%s5556_s20 + $0xc8] sm:$0xff] %vm2997_vm2, %v2990_v60  ;;  %v2989_v10 = vadd.f32 %v2926_v14, %v2721_v2  ;;  %v2724_v16 = vadd.f32 %v4126_v49, %v2456_v33  ;;  %v2936_v54 = vpop.f32.mrf.mxu0 }
 0x1eb   : > { %v2668_v27 = vpop.f32.mrf.mxu1 }
 0x1ec   : > { %3022 = vst.msk [vmem:[%s5556_s20 + $0xc0] sm:$0xff] %vm2997_vm2, %v2989_v10  ;;  %v2992_v8 = vadd.f32 %v4176_v17, %v2724_v16  ;;  %v2723_v63 = vadd.f32 %v2668_v27, %v2455_v48  ;;  %v4179_v53 = vpop.f32.mrf.mxu0 }
 0x1ed   : > { %v4129_v37 = vpop.f32.mrf.mxu1 }
 0x1ee   : > { %3025 = vst.msk [vmem:[%s5556_s20 + $0xd8] sm:$0xff] %vm2997_vm2, %v2992_v8  ;;  %v2991_v26 = vadd.f32 %v2936_v54, %v2723_v63  ;;  %v2726_v25 = vadd.f32 %v4129_v37, %v2458_v18  ;;  %v2946_v39 = vpop.f32.mrf.mxu0 }
 0x1ef   : > { %v2678_v38 = vpop.f32.mrf.mxu1 }
 0x1f0   : > { %3024 = vst.msk [vmem:[%s5556_s20 + $0xd0] sm:$0xff] %vm2997_vm2, %v2991_v26  ;;  %v2994_v3 = vadd.f32 %v4179_v53, %v2726_v25  ;;  %v2725_v4 = vadd.f32 %v2678_v38, %v2457_v15  ;;  %v4182_v40 = vpop.f32.mrf.mxu0 }
 0x1f1   : > { %v4132_v24 = vpop.f32.mrf.mxu1 }
 0x1f2   : > { %3027 = vst.msk [vmem:[%s5556_s20 + $0xe8] sm:$0xff] %vm2997_vm2, %v2994_v3  ;;  %v2993_v1 = vadd.f32 %v2946_v39, %v2725_v4  ;;  %v2728_v7 = vadd.f32 %v4132_v24, %v2460_v51  ;;  %v2956_v41 = vpop.f32.mrf.mxu0 }
 0x1f3   : > { %v2688_v20 = vpop.f32.mrf.mxu1 }
 0x1f4   : > { %3026 = vst.msk [vmem:[%s5556_s20 + $0xe0] sm:$0xff] %vm2997_vm2, %v2993_v1  ;;  %v2996_v12 = vadd.f32 %v4182_v40, %v2728_v7  ;;  %v2727_v35 = vadd.f32 %v2688_v20, %v2459_v22 }
 0x1f6   : > { %3029 = vst.msk [vmem:[%s5556_s20 + $0xf8] sm:$0xff] %vm2997_vm2, %v2996_v12  ;;  %v2995_v47 = vadd.f32 %v2956_v41, %v2727_v35 }
 0x1f8   : > { %3028 = vst.msk [vmem:[%s5556_s20 + $0xf0] sm:$0xff] %vm2997_vm2, %v2995_v47 }
 0x1f9 PF: > { %s13_s14 = sadd.s32 1, %s4232_s14   ;;  %s5823_s12 = smov %s4228_s13 }
 0x1fa   : > { %p10_p5 = scmp.ge.s32.totalorder %s13_s14, 4   ;;  %s5824_s13 = smov %s5826_s15 }
 0x1fc   :  { %12 = sbr.rel (!%p10_p5) target bundleno = 2 (0x2), region = 71 }

</bundles_post_ra>
